<compile_context>
chip_gen: v5e
topology: v5e:2x2
jax: 0.10.0
libtpu: 0.0.40
codegen_flags: <defaults>
</compile_context>

<pallas_src>
import math

import jax
import jax.numpy as jnp
from jax.experimental import pallas as pl
from jax.experimental.pallas import tpu as pltpu


def _tile_cumsum(x):
    """Inclusive cumsum along axis 0 via log2(n) doubling (static shapes)."""
    n = x.shape[0]
    shift = 1
    while shift < n:
        zeros = jnp.zeros((shift,) + x.shape[1:], x.dtype)
        x = x + jnp.concatenate([zeros, x[: n - shift]], axis=0)
        shift *= 2
    return x


def _make_kernel(pad_idx: int, embed_dim: int):
    half = embed_dim // 2

    def kernel(tok_ref, freq_ref, out_ref, carry_ref):
        # carry_ref: (1, B) int32 running count of non-pad tokens per column.
        @pl.when(pl.program_id(0) == 0)
        def _():
            carry_ref[...] = jnp.zeros_like(carry_ref)

        tokens = tok_ref[...]                                  # (TS, B) int32
        mask_i = (tokens != pad_idx).astype(jnp.int32)         # (TS, B)

        # Incremental masked cumsum over the sequence axis.
        csum = _tile_cumsum(mask_i) + carry_ref[...]           # (TS, B)
        carry_ref[...] = csum[mask_i.shape[0] - 1:, :]         # new running count

        maskf = mask_i.astype(jnp.float32)                     # (TS, B)
        # make_positions: cumsum(mask) * mask + pad_idx
        positions = csum.astype(jnp.float32) * maskf + float(pad_idx)

        # emb[p] = [sin(p * f_k), cos(p * f_k)]; pad rows zeroed (table row
        # pad_idx is all-zeros in the torch module).
        ang = positions[:, :, None] * freq_ref[...]            # (TS, B, half)
        m3 = maskf[:, :, None]                                 # (TS, B, 1)
        out_ref[:, :, :half] = (jnp.sin(ang) * m3).astype(out_ref.dtype)
        out_ref[:, :, half:] = (jnp.cos(ang) * m3).astype(out_ref.dtype)

    return kernel


def sinusoidal_positional_embedding(input_ids, pad_idx: int, embed_dim: int,
                                    *, seq_tile: int | None = None,
                                    out_dtype=jnp.float32):
    """Equivalent of SinusoidalPositionalEmbedding.forward(input) (no
    incremental_state)."""
    # TODO(synk): odd embed_dim appends a trailing zero column in the torch
    # module; only even embed_dim >= 4 supported here.
    assert embed_dim % 2 == 0 and embed_dim >= 4
    S, B = input_ids.shape
    half = embed_dim // 2

    # Precompute the frequency vector once (kept resident; no per-step exp).
    neg_log = -math.log(10000.0) / (half - 1)
    inv_freq = jnp.exp(
        jnp.arange(half, dtype=jnp.float32) * neg_log).reshape(1, 1, half)

    # Tile size: target ~4 MiB per output buffer (double-buffered), so it
    # fits comfortably under v7x's smaller VMEM while staying near the HBM
    # roofline on v5e/v6e.
    if seq_tile is None:
        target_bytes = 4 * 1024 * 1024
        ts = max(8, target_bytes // max(1, B * embed_dim * 4))
        ts = int(min(S, ts))
    else:
        ts = int(min(S, seq_tile))
    if ts != S:
        ts = max(8, (ts // 8) * 8)   # sublane-dim constraint for (TS, B) block
    grid = (pl.cdiv(S, ts),)

    kernel = _make_kernel(pad_idx, embed_dim)
    return pl.pallas_call(
        kernel,
        out_shape=jax.ShapeDtypeStruct((S, B, embed_dim), out_dtype),
        grid_spec=pltpu.PrefetchScalarGridSpec(
            num_scalar_prefetch=0,
            grid=grid,
            in_specs=[
                pl.BlockSpec((ts, B), lambda s: (s, 0)),
                pl.BlockSpec((1, 1, half), lambda s: (0, 0, 0)),
            ],
            out_specs=pl.BlockSpec((ts, B, embed_dim), lambda s: (s, 0, 0)),
            scratch_shapes=[pltpu.VMEM((1, B), jnp.int32)],
        ),
        compiler_params=pltpu.CompilerParams(
            # The sequence axis carries the running cumsum -> "arbitrary".
            dimension_semantics=("arbitrary",),
            vmem_limit_bytes=64 * 1024 * 1024,
        ),
    )(input_ids.astype(jnp.int32), inv_freq)


def _reference(input_ids, pad_idx: int, embed_dim: int, init_size: int = 1024):
    """Pure-JAX transcription of the PyTorch module (table build + gather)."""
    half = embed_dim // 2
    scale = math.log(10000.0) / (half - 1)
    freq = jnp.exp(jnp.arange(half, dtype=jnp.float32) * -scale)
    table = jnp.arange(init_size, dtype=jnp.float32)[:, None] * freq[None, :]
    table = jnp.concatenate([jnp.sin(table), jnp.cos(table)], axis=1)
    table = table.at[pad_idx, :].set(0.0)

    mask = (input_ids != pad_idx).astype(jnp.int32)
    pos = jnp.cumsum(mask, axis=0) * mask + pad_idx
    S, B = input_ids.shape
    return table[pos.reshape(-1)].reshape(S, B, embed_dim)


if __name__ == "__main__":
    pad_idx = 1
    key = jax.random.PRNGKey(0)

    # Small single-tile check.
    slen, bsz, embed_dim = 8, 4, 32
    input_ids = jax.random.randint(key, (slen, bsz), 0, 8, dtype=jnp.int32)
    out = jax.block_until_ready(
        sinusoidal_positional_embedding(input_ids, pad_idx, embed_dim))
    ref = _reference(input_ids, pad_idx, embed_dim)
    assert out.shape == (slen, bsz, embed_dim)
    assert out.dtype == jnp.float32
    assert jnp.allclose(out, ref, atol=1e-4, rtol=1e-4), "mismatch (single tile)"

    # Multi-tile check: forces the grid + carried cumsum path (4 S-tiles).
    slen2, bsz2 = 64, 4
    key2 = jax.random.PRNGKey(0)
    input_ids2 = jax.random.randint(key2, (slen2, bsz2), 0, 8, dtype=jnp.int32)
    out2 = jax.block_until_ready(
        sinusoidal_positional_embedding(input_ids2, pad_idx, embed_dim,
                                        seq_tile=16))
    ref2 = _reference(input_ids2, pad_idx, embed_dim)
    assert jnp.allclose(out2, ref2, atol=1e-4, rtol=1e-4), "mismatch (multi tile)"

    print("KERNEL_OK")
</pallas_src>

<mosaic_0001>
module attributes {stable_mosaic.version = 11 : i64} {
  func.func @kernel(%arg0: i32, %arg1: memref<8x4xi32, #tpu.memory_space<vmem>>, %arg2: memref<1x1x16xf32, #tpu.memory_space<vmem>>, %arg3: memref<8x4x32xf32, #tpu.memory_space<vmem>>, %arg4: memref<1x4xi32, #tpu.memory_space<vmem>>) attributes {dimension_semantics = [#tpu.dimension_semantics<arbitrary>], iteration_bounds = array<i64: 1>, scalar_prefetch = 0 : i64, scratch_operands = 1 : i64, tpu.core_type = #tpu.core_type<tc>, window_params = [{transform_indices = @transform_0, window_bounds = array<i64: 8, 4>}, {pipeline_mode = #tpu.pipeline_mode<synchronous>, transform_indices = @transform_1, window_bounds = array<i64: 1, 1, 16>}, {transform_indices = @transform_2, window_bounds = array<i64: 8, 4, 32>}]} {
    %c0_i32 = arith.constant 0 : i32
    %0 = arith.cmpi eq, %arg0, %c0_i32 : i32
    %1 = arith.extui %0 : i1 to i32
    %c0_i32_0 = arith.constant 0 : i32
    %2 = arith.cmpi ne, %1, %c0_i32_0 : i32
    scf.if %2 {
      %c0_i32_17 = arith.constant 0 : i32
      %43 = vector.broadcast %c0_i32_17 : i32 to vector<1x4xi32>
      %c0_18 = arith.constant 0 : index
      %c0_19 = arith.constant 0 : index
      %44 = vector.load %arg4[%c0_18, %c0_19] : memref<1x4xi32, #tpu.memory_space<vmem>>, vector<1x4xi32>
      tpu.vector_store %arg4[%c0_18, %c0_19], %43 {strides = array<i32>} : memref<1x4xi32, #tpu.memory_space<vmem>>, vector<1x4xi32>,
    } else {
    }
    %c0 = arith.constant 0 : index
    %c0_1 = arith.constant 0 : index
    %3 = vector.load %arg1[%c0, %c0_1] : memref<8x4xi32, #tpu.memory_space<vmem>>, vector<8x4xi32>
    %c1_i32 = arith.constant 1 : i32
    %4 = vector.broadcast %c1_i32 : i32 to vector<8x4xi32>
    %5 = arith.cmpi ne, %3, %4 : vector<8x4xi32>
    %6 = arith.extui %5 : vector<8x4xi1> to vector<8x4xi32>
    %c0_i32_2 = arith.constant 0 : i32
    %7 = vector.broadcast %c0_i32_2 : i32 to vector<1x4xi32>
    %8 = vector.extract_strided_slice %6 {offsets = [0, 0], sizes = [7, 4], strides = [1, 1]} : vector<8x4xi32> to vector<7x4xi32>
    %9 = tpu.concatenate %7, %8 in 0 : vector<1x4xi32>, vector<7x4xi32> -> vector<8x4xi32>
    %10 = arith.addi %6, %9 : vector<8x4xi32>
    %c0_i32_3 = arith.constant 0 : i32
    %11 = vector.broadcast %c0_i32_3 : i32 to vector<2x4xi32>
    %12 = vector.extract_strided_slice %10 {offsets = [0, 0], sizes = [6, 4], strides = [1, 1]} : vector<8x4xi32> to vector<6x4xi32>
    %13 = tpu.concatenate %11, %12 in 0 : vector<2x4xi32>, vector<6x4xi32> -> vector<8x4xi32>
    %14 = arith.addi %10, %13 : vector<8x4xi32>
    %c0_i32_4 = arith.constant 0 : i32
    %15 = vector.broadcast %c0_i32_4 : i32 to vector<4x4xi32>
    %16 = vector.extract_strided_slice %14 {offsets = [0, 0], sizes = [4, 4], strides = [1, 1]} : vector<8x4xi32> to vector<4x4xi32>
    %17 = tpu.concatenate %15, %16 in 0 : vector<4x4xi32>, vector<4x4xi32> -> vector<8x4xi32>
    %18 = arith.addi %14, %17 : vector<8x4xi32>
    %c0_5 = arith.constant 0 : index
    %c0_6 = arith.constant 0 : index
    %19 = vector.load %arg4[%c0_5, %c0_6] : memref<1x4xi32, #tpu.memory_space<vmem>>, vector<1x4xi32>
    %20 = vector.broadcast %19 : vector<1x4xi32> to vector<8x4xi32>
    %21 = arith.addi %18, %20 : vector<8x4xi32>
    %22 = vector.extract_strided_slice %21 {offsets = [7, 0], sizes = [1, 4], strides = [1, 1]} : vector<8x4xi32> to vector<1x4xi32>
    %c0_7 = arith.constant 0 : index
    %c0_8 = arith.constant 0 : index
    %23 = vector.load %arg4[%c0_7, %c0_8] : memref<1x4xi32, #tpu.memory_space<vmem>>, vector<1x4xi32>
    tpu.vector_store %arg4[%c0_7, %c0_8], %22 {strides = array<i32>} : memref<1x4xi32, #tpu.memory_space<vmem>>, vector<1x4xi32>,
    %24 = arith.sitofp %6 : vector<8x4xi32> to vector<8x4xf32>
    %25 = arith.sitofp %21 : vector<8x4xi32> to vector<8x4xf32>
    %26 = arith.mulf %25, %24 : vector<8x4xf32>
    %cst = arith.constant 1.000000e+00 : f32
    %27 = vector.broadcast %cst : f32 to vector<8x4xf32>
    %28 = arith.addf %26, %27 : vector<8x4xf32>
    %29 = vector.shape_cast %28 : vector<8x4xf32> to vector<8x4x1xf32>
    %c0_9 = arith.constant 0 : index
    %c0_10 = arith.constant 0 : index
    %c0_11 = arith.constant 0 : index
    %30 = vector.load %arg2[%c0_9, %c0_10, %c0_11] : memref<1x1x16xf32, #tpu.memory_space<vmem>>, vector<1x1x16xf32>
    %31 = vector.broadcast %29 : vector<8x4x1xf32> to vector<8x4x16xf32>
    %32 = vector.broadcast %30 : vector<1x1x16xf32> to vector<8x4x16xf32>
    %33 = arith.mulf %31, %32 : vector<8x4x16xf32>
    %34 = vector.shape_cast %24 : vector<8x4xf32> to vector<8x4x1xf32>
    %35 = math.sin %33 : vector<8x4x16xf32>
    %36 = vector.broadcast %34 : vector<8x4x1xf32> to vector<8x4x16xf32>
    %37 = arith.mulf %35, %36 : vector<8x4x16xf32>
    %c0_12 = arith.constant 0 : index
    %c0_13 = arith.constant 0 : index
    %c0_14 = arith.constant 0 : index
    %38 = vector.load %arg3[%c0_12, %c0_13, %c0_14] : memref<8x4x32xf32, #tpu.memory_space<vmem>>, vector<8x4x16xf32>
    tpu.vector_store %arg3[%c0_12, %c0_13, %c0_14], %37 {strides = array<i32>} : memref<8x4x32xf32, #tpu.memory_space<vmem>>, vector<8x4x16xf32>,
    %39 = math.cos %33 : vector<8x4x16xf32>
    %40 = vector.broadcast %34 : vector<8x4x1xf32> to vector<8x4x16xf32>
    %41 = arith.mulf %39, %40 : vector<8x4x16xf32>
    %c0_15 = arith.constant 0 : index
    %c0_16 = arith.constant 0 : index
    %c16 = arith.constant 16 : index
    %42 = vector.load %arg3[%c0_15, %c0_16, %c16] : memref<8x4x32xf32, #tpu.memory_space<vmem>>, vector<8x4x16xf32>
    tpu.vector_store %arg3[%c0_15, %c0_16, %c16], %41 {strides = array<i32>} : memref<8x4x32xf32, #tpu.memory_space<vmem>>, vector<8x4x16xf32>,
    return
  }
  func.func @transform_0(%arg0: i32) -> (i32, i32) {
    %c0_i32 = arith.constant 0 : i32
    %c0_i32_0 = arith.constant 0 : i32
    return %arg0, %c0_i32 : i32, i32
  }
  func.func @transform_1(%arg0: i32) -> (i32, i32, i32) {
    %c0_i32 = arith.constant 0 : i32
    %c0_i32_0 = arith.constant 0 : i32
    %c0_i32_1 = arith.constant 0 : i32
    %c0_i32_2 = arith.constant 0 : i32
    return %c0_i32, %c0_i32_0, %c0_i32_1 : i32, i32, i32
  }
  func.func @transform_2(%arg0: i32) -> (i32, i32, i32) {
    %c0_i32 = arith.constant 0 : i32
    %c0_i32_0 = arith.constant 0 : i32
    %c0_i32_1 = arith.constant 0 : i32
    return %arg0, %c0_i32, %c0_i32_0 : i32, i32, i32
  }
}

</mosaic_0001>

<bundles_post_ra>
// kernel: tpu_custom_call.1
= control target key start
LH: loop header
LB: loop body
LE: loop exit
PB: predicated region body
PF: predicated region fallthrough
CT: control target
= control target key end

     0   :  { %v43_v0 = vlaneseq  ;;  %vm16_vm0 = vcmask 24576   ;;  %v2835_v2 = vmov 0   ;;  %vm22_vm2 = vcmask 1040384   ;;  %s4022_s0 = inlined_call_operand.vmem [shape: s32[8,4], index: 0, kind: input, shape index: {}]   ;;  %s4023_s1 = inlined_call_operand.vmem [shape: f32[1,1,16], index: 1, kind: input, shape index: {}]   ;;  %s4024_s2 = inlined_call_operand.hbm [shape: f32[8,4,32], index: 2, kind: output, shape index: {}]  }
   0x1   :  { %v18_v1 = vld [vmem:[%s4022_s0] sm:$0xff]  ;;  %17 = vst.msk [vmem:[#allocation2] sm:$0x1] %vm16_vm0, %v2835_v2 }
   0x2   :  { %vm19_vm1 = vcmp.ne.s32.totalorder %v18_v1, 1  ;;  %v44_v3 = vshrl.u32 %v43_v0, 7 }
   0x3   :  { %v20_v4 = vsel %vm19_vm1, 1, %v2835_v2 }
   0x4   :  { %7 = vsyncpa [#allocation4], 0  ;;  %v21_v5 = vrot.slane %v20_v4, 7  ;;  %2785 = vset.pattern.permute.xlu2 %v44_v3  ;;  %2784 = vset.pattern.permute.xlu1 %v44_v3  ;;  %vm26_vm3 = vcmask 1041408   ;;  %vm30_vm4 = vcmask 1043456   ;;  %vm36_vm5 = vcmask 31751  }
   0x5   :  { %2783 = vset.pattern.permute.xlu0 %v44_v3  ;;  %v2836_v16 = vmov 0.0   ;;  %v2872_v41 = vld [vmem:[%s4023_s1] ss:$0 sm:$0xff]  ;;  %v2837_v61 = vmov 683565275   ;;  %s2843_s14 = smov 16  }
   0x6   :  { %v23_v6 = vsel %vm22_vm2, 0, %v21_v5  ;;  %v2722_v17 = vsel %vm19_vm1, 1.0, %v2836_v16  ;;  %v2838_v63 = vmov 2475754826   ;;  %v2839_v1 = vmov 2131351028  }
   0x7   :  { %v24_v7 = vadd.s32 %v23_v6, %v20_v4  ;;  %v110_v27 = vperm.slane %v2722_v17, 0  ;;  %v117_v28 = vperm.slane %v2722_v17, 1  ;;  %v138_v32 = vperm.slane %v2722_v17, 4  ;;  %s2710_s18 = sshll.u32 %s4024_s2, 4  ;;  %s2845_s19 = smov 64   ;;  %s2711_s18 = int_to_ptr.hbm [resolvable:$true] %s2710_s18 }
   0x8   :  { %v2806_v12 = vld [vmem:[#allocation2] ss:$0 sm:$0xff]  ;;  %v145_v33 = vperm.slane %v2722_v17, 5  ;;  %v152_v34 = vperm.slane %v2722_v17, 6  ;;  %v159_v35 = vperm.slane %v2722_v17, 7  ;;  %v124_v36 = vperm.slane %v2722_v17, 2 }
   0x9   :  { %v25_v8 = vrot.slane %v24_v7, 6  ;;  %v2786_v30 = vpack.i.bf16 %v117_v28, %v110_v27  ;;  %v131_v37 = vperm.slane %v2722_v17, 3  ;;  %v2840_v4 = vmov 2102212464   ;;  %s2846_s20 = smov 4  }
   0xa   :  { %v2796_v38 = vpack.i.bf16 %v145_v33, %v138_v32  ;;  %v2801_v39 = vpack.i.bf16 %v159_v35, %v152_v34  ;;  %v2841_v6 = vmov 920167782   ;;  %v4030_v16 = vmov 1326507024  }
   0xb   :  { %v27_v9 = vsel %vm26_vm3, 0, %v25_v8  ;;  %v2791_v40 = vpack.i.bf16 %v131_v37, %v124_v36 }
   0xc   :  { %v28_v10 = vadd.s32 %v27_v9, %v24_v7 }
   0xe   :  { %v29_v11 = vrot.slane %v28_v10, 4 }
  0x10   :  { %v31_v13 = vsel %vm30_vm4, 0, %v29_v11 }
  0x11   :  { %v32_v14 = vadd.s32 %v31_v13, %v28_v10 }
  0x13   :  { %v35_v15 = vadd.s32 %v2806_v12, %v32_v14 }
  0x15   :  { %v39_v18 = vcvt.s32.f32 %v35_v15  ;;  %37 = vst.msk [vmem:[#allocation2 - $0x7] sm:$0x80] %vm36_vm5, %v35_v15 }
  0x17   :  { %v40_v19 = vmul.f32 %v2722_v17, %v39_v18 }
  0x19   :  { %v41_v20 = vadd.f32 1.0, %v40_v19 }
  0x1b   :  { %v70_v21 = vperm.slane %v41_v20, 4  ;;  %v56_v22 = vperm.slane %v41_v20, 2  ;;  %v42_v23 = vperm.slane %v41_v20, 0  ;;  %v77_v24 = vperm.slane %v41_v20, 5 }
  0x1c   :  { %v63_v25 = vperm.slane %v41_v20, 3  ;;  %v49_v26 = vperm.slane %v41_v20, 1  ;;  %v91_v29 = vperm.slane %v41_v20, 7  ;;  %v84_v31 = vperm.slane %v41_v20, 6 }
  0x1d   :  { %75 = vperm.xlu2 %2785, %v70_v21   ;;  %61 = vperm.xlu1 %2784, %v56_v22  }
  0x1e   :  { %47 = vperm.xlu0 %2783, %v42_v23  }
  0x25   :  { %82 = vperm.xlu2 %2785, %v77_v24   ;;  %68 = vperm.xlu1 %2784, %v63_v25  }
  0x26   :  { %54 = vperm.xlu0 %2783, %v49_v26  }
  0x2d   :  { %96 = vperm.xlu1 %2784, %v91_v29   ;;  %2787 = vperm.xlu2 %2785, %v2786_v30  }
  0x2e   :  { %89 = vperm.xlu0 %2783, %v84_v31  }
  0x35   :  { %2797 = vperm.xlu1 %2784, %v2796_v38   ;;  %2802 = vperm.xlu2 %2785, %v2801_v39  }
  0x36   :  { %2792 = vperm.xlu0 %2783, %v2791_v40  }
  0x77   :  { %v76_v42 = vpop.permute.xlu2 %75 }
  0x78   :  { %v2875_v43 = vmul.f32 %v2872_v41, %v76_v42 }
  0x7a   :  { %v786_v44 = vand.u32 2147483647, %v2875_v43  ;;  %v789_v45 = vand.u32 2139095040, %v2875_v43 }
  0x7c   :  { %v790_v46 = vshrl.u32 %v789_v45, 23  ;;  %v793_v47 = vand.u32 8388607, %v786_v44 }
  0x7e   :  { %v2735_v48 = vadd.s32 4294967169, %v790_v46  ;;  %v794_v49 = vor.u32 8388608, %v793_v47 }
  0x7f   :  { %v83_v50 = vpop.permute.xlu2 %82 }
  0x80   :  { %v796_v51 = vadd.s32 1, %v2735_v48  ;;  %v2882_v52 = vmul.f32 %v2872_v41, %v83_v50  ;;  %v2884_v53 = vshll.u32 %v794_v49, 8 }
  0x82   :  { %vm797_vm6 = vcmp.gt.s32.totalorder %v796_v51, 0  ;;  %v944_v55 = vand.u32 2139095040, %v2882_v52  ;;  %v941_v57 = vand.u32 2147483647, %v2882_v52  ;;  %v835_v59 = vand.u32 65535, %v2884_v53 }
  0x83   :  { %v798_v54 = vsel %vm797_vm6, %v796_v51, 0  ;;  %v836_v8 = vshrl.u32 %v2884_v53, 16 }
  0x84   :  { %v800_v56 = vand.u32 31, %v798_v54  ;;  %v799_v58 = vshrl.u32 %v798_v54, 5  ;;  %v945_v9 = vshrl.u32 %v944_v55, 23  ;;  %v948_v13 = vand.u32 8388607, %v941_v57 }
  0x86   :  { %v801_v60 = vsub.s32 32, %v800_v56  ;;  %v803_v62 = vshll.u32 %v2837_v61, %v800_v56  ;;  %v806_v0 = vshll.u32 %v2838_v63, %v800_v56  ;;  %v809_v3 = vshll.u32 %v2839_v1, %v800_v56 }
  0x87   :  { %v812_v5 = vshll.u32 %v2840_v4, %v800_v56  ;;  %v815_v7 = vshll.u32 %v2841_v6, %v800_v56  ;;  %vm818_vm7 = vcmp.lt.s32.totalorder %v799_v58, 1  ;;  %vm821_vm8 = vcmp.lt.s32.totalorder %v799_v58, 4 }
  0x88   :  { %v804_v10 = vshrl.u32 %v2838_v63, %v801_v60  ;;  %v807_v11 = vshrl.u32 %v2839_v1, %v801_v60  ;;  %v810_v12 = vshrl.u32 %v2840_v4, %v801_v60  ;;  %v802_v14 = vshrl.u32 %v2837_v61, %v801_v60 }
  0x89   :  { %v813_v15 = vshrl.u32 %v2841_v6, %v801_v60  ;;  %v816_v17 = vshrl.u32 %v4030_v16, %v801_v60  ;;  %vm820_vm9 = vcmp.lt.s32.totalorder %v799_v58, 3  ;;  %v2738_v23 = vadd.s32 4294967169, %v945_v9 }
  0x8a   :  { %v805_v18 = vor.u32 %v804_v10, %v803_v62  ;;  %v808_v19 = vor.u32 %v807_v11, %v806_v0  ;;  %v811_v20 = vor.u32 %v810_v12, %v809_v3  ;;  %vm819_vm10 = vcmp.lt.s32.totalorder %v799_v58, 2 }
  0x8b   :  { %v814_v21 = vor.u32 %v813_v15, %v812_v5  ;;  %v817_v22 = vor.u32 %v816_v17, %v815_v7  ;;  %v949_v29 = vor.u32 8388608, %v948_v13  ;;  %v951_v30 = vadd.s32 1, %v2738_v23 }
  0x8c   :  { %v823_v24 = vsel %vm821_vm8, %v811_v20, 2102212464  ;;  %v826_v25 = vsel %vm818_vm7, %v805_v18, %v808_v19  ;;  %v830_v26 = vsel %vm818_vm7, %v808_v19, %v811_v20  ;;  %v822_v31 = vsel %vm818_vm7, %v802_v14, %v805_v18 }
  0x8d   :  { %v827_v27 = vsel %vm821_vm8, %v814_v21, 920167782  ;;  %v831_v28 = vsel %vm821_vm8, %v817_v22, 1326507024  ;;  %v824_v32 = vsel %vm820_vm9, %v808_v19, %v823_v24  ;;  %vm952_vm11 = vcmp.gt.s32.totalorder %v951_v30, 0 }
  0x8e   :  { %v828_v33 = vsel %vm820_vm9, %v811_v20, %v827_v27  ;;  %v832_v34 = vsel %vm820_vm9, %v814_v21, %v831_v28  ;;  %v2909_v42 = vsel %vm819_vm10, %v822_v31, %v824_v32  ;;  %v2911_v48 = vshll.u32 %v949_v29, 8 }
  0x8f   :  { %v829_v35 = vsel %vm819_vm10, %v826_v25, %v828_v33  ;;  %v833_v36 = vsel %vm819_vm10, %v830_v26, %v832_v34  ;;  %v953_v54 = vsel %vm952_vm11, %v951_v30, 0 }
  0x90   :  { %v837_v37 = vand.u32 65535, %v833_v36  ;;  %v838_v38 = vshrl.u32 %v833_v36, 16  ;;  %v859_v39 = vand.u32 65535, %v829_v35  ;;  %v860_v40 = vshrl.u32 %v829_v35, 16 }
  0x91   :  { %v955_v10 = vand.u32 31, %v953_v54  ;;  %v2916_v18 = vshrl.u32 %v953_v54, 5 }
  0x92   :  { %v839_v45 = vmul.u32 %v837_v37, %v835_v59  ;;  %v840_v46 = vmul.u32 %v838_v38, %v835_v59  ;;  %v841_v47 = vmul.u32 %v837_v37, %v836_v8  ;;  %v861_v49 = vmul.u32 %v859_v39, %v835_v59 }
  0x93   :  { %v862_v50 = vmul.u32 %v860_v40, %v835_v59  ;;  %v863_v51 = vmul.u32 %v859_v39, %v836_v8  ;;  %v842_v55 = vmul.u32 %v838_v38, %v836_v8  ;;  %v864_v62 = vmul.u32 %v860_v40, %v836_v8 }
  0x94   :  { %v843_v56 = vshll.u32 %v840_v46, 16  ;;  %v845_v60 = vshll.u32 %v841_v47, 16  ;;  %v844_v0 = vshrl.u32 %v840_v46, 16  ;;  %v846_v3 = vshrl.u32 %v841_v47, 16 }
  0x95   :  { %v865_v5 = vshll.u32 %v862_v50, 16  ;;  %v867_v7 = vshll.u32 %v863_v51, 16  ;;  %v866_v9 = vshrl.u32 %v862_v50, 16  ;;  %v868_v12 = vshrl.u32 %v863_v51, 16 }
  0x96   :  { %vm847_vm12 = vc.u32 %v839_v45, %v843_v56  ;;  %v849_v58 = vadd.s32 %v843_v56, %v839_v45  ;;  %v956_v15 = vsub.s32 32, %v955_v10  ;;  %v958_v22 = vshll.u32 %v2837_v61, %v955_v10 }
  0x97   :  { %v848_v11 = vsel %vm847_vm12, 1, %v2835_v2  ;;  %vm869_vm13 = vc.u32 %v861_v49, %v865_v5  ;;  %v871_v13 = vadd.s32 %v865_v5, %v861_v49  ;;  %v961_v25 = vshll.u32 %v2838_v63, %v955_v10 }
  0x98   :  { %v850_v59 = vadd.s32 %v848_v11, %v842_v55  ;;  %vm851_vm14 = vc.u32 %v849_v58, %v845_v60  ;;  %v870_v14 = vsel %vm869_vm13, 1, %v2835_v2  ;;  %v959_v24 = vshrl.u32 %v2838_v63, %v956_v15 }
  0x99   :  { %v852_v8 = vsel %vm851_vm14, 1, %v2835_v2  ;;  %v872_v17 = vadd.s32 %v870_v14, %v864_v62  ;;  %vm873_vm15 = vc.u32 %v871_v13, %v867_v7  ;;  %v2919_v21 = vadd.s32 %v871_v13, %v867_v7 }
  0x9a   :  { %v854_v19 = vadd.s32 %v852_v8, %v850_v59  ;;  %v874_v20 = vsel %vm873_vm15, 1, %v2835_v2  ;;  %v962_v26 = vshrl.u32 %v2839_v1, %v956_v15  ;;  %v964_v28 = vshll.u32 %v2839_v1, %v955_v10 }
  0x9b   :  { %v876_v23 = vadd.s32 %v874_v20, %v872_v17  ;;  %v965_v29 = vshrl.u32 %v2840_v4, %v956_v15  ;;  %v967_v30 = vshll.u32 %v2840_v4, %v955_v10  ;;  %v960_v32 = vor.u32 %v959_v24, %v958_v22 }
  0x9c   :  { %v855_v27 = vadd.s32 %v854_v19, %v844_v0  ;;  %v963_v33 = vor.u32 %v962_v26, %v961_v25  ;;  %v968_v34 = vshrl.u32 %v2841_v6, %v956_v15  ;;  %v970_v37 = vshll.u32 %v2841_v6, %v955_v10 }
  0x9d   :  { %v877_v31 = vadd.s32 %v876_v23, %v866_v9  ;;  %v966_v36 = vor.u32 %v965_v29, %v964_v28  ;;  %v971_v38 = vshrl.u32 %v4030_v16, %v956_v15  ;;  %vm973_vm0 = vcmp.lt.s32.totalorder %v2916_v18, 1 }
  0x9e   :  { %v2929_v35 = vadd.s32 %v855_v27, %v846_v3  ;;  %v969_v40 = vor.u32 %v968_v34, %v967_v30  ;;  %v879_v45 = vmul.u32 %v2884_v53, %v2909_v42  ;;  %vm975_vm2 = vcmp.lt.s32.totalorder %v2916_v18, 3 }
  0x9f   :  { %v878_v39 = vadd.s32 %v877_v31, %v868_v12  ;;  %v972_v46 = vor.u32 %v971_v38, %v970_v37  ;;  %vm974_vm3 = vcmp.lt.s32.totalorder %v2916_v18, 2  ;;  %vm976_vm4 = vcmp.lt.s32.totalorder %v2916_v18, 4  ;;  %v62_v12 = vpop.permute.xlu1 %61 }
  0xa0   :  { %vm881_vm1 = vc.u32 %v2929_v35, %v2919_v21  ;;  %v981_v49 = vsel %vm973_vm0, %v960_v32, %v963_v33  ;;  %v982_v50 = vsel %vm976_vm4, %v969_v40, 920167782  ;;  %v985_v53 = vsel %vm973_vm0, %v963_v33, %v966_v36 }
  0xa1   :  { %v882_v47 = vadd.s32 1, %v878_v39  ;;  %v986_v42 = vsel %vm976_vm4, %v972_v46, 1326507024  ;;  %v990_v51 = vand.u32 65535, %v2911_v48  ;;  %v983_v55 = vsel %vm975_vm2, %v966_v36, %v982_v50 }
  0xa2   :  { %v987_v56 = vsel %vm975_vm2, %v969_v40, %v986_v42  ;;  %v991_v60 = vshrl.u32 %v2911_v48, 16  ;;  %v984_v0 = vsel %vm974_vm3, %v981_v49, %v983_v55  ;;  %v957_v11 = vshrl.u32 %v2837_v61, %v956_v15 }
  0xa3   :  { %v883_v54 = vsel %vm881_vm1, %v882_v47, %v878_v39  ;;  %v988_v3 = vsel %vm974_vm3, %v985_v53, %v987_v56  ;;  %v1014_v58 = vand.u32 65535, %v984_v0  ;;  %v1015_v9 = vshrl.u32 %v984_v0, 16 }
  0xa4   :  { %v884_v62 = vadd.s32 %v883_v54, %v879_v45  ;;  %v992_v5 = vand.u32 65535, %v988_v3  ;;  %v993_v7 = vshrl.u32 %v988_v3, 16  ;;  %v978_v13 = vsel %vm976_vm4, %v966_v36, 2102212464 }
  0xa5   :  { %v1016_v19 = vmul.u32 %v1014_v58, %v990_v51  ;;  %v1017_v20 = vmul.u32 %v1015_v9, %v990_v51  ;;  %v1018_v22 = vmul.u32 %v1014_v58, %v991_v60  ;;  %v2965_v26 = vmul.f32 %v2872_v41, %v62_v12 }
  0xa6   :  { %v885_v10 = vadd.s32 536870912, %v884_v62  ;;  %v994_v59 = vmul.u32 %v992_v5, %v990_v51  ;;  %v995_v14 = vmul.u32 %v993_v7, %v990_v51  ;;  %v996_v8 = vmul.u32 %v992_v5, %v991_v60 }
  0xa7   :  { %v997_v23 = vmul.u32 %v993_v7, %v991_v60  ;;  %v977_v27 = vsel %vm973_vm0, %v957_v11, %v960_v32  ;;  %v1019_v28 = vmul.u32 %v1015_v9, %v991_v60  ;;  %v1020_v29 = vshll.u32 %v1017_v20, 16  ;;  %v48_v9 = vpop.permute.xlu0 %47 }
  0xa8   :  { %v2962_v17 = vshrl.u32 %v885_v10, 30  ;;  %v998_v24 = vshll.u32 %v995_v14, 16  ;;  %v1000_v25 = vshll.u32 %v996_v8, 16  ;;  %v979_v30 = vsel %vm975_vm2, %v963_v33, %v978_v13 }
  0xa9   :  { %v1022_v34 = vshll.u32 %v1018_v22, 16  ;;  %v999_v36 = vshrl.u32 %v995_v14, 16  ;;  %vm1024_vm6 = vc.u32 %v1016_v19, %v1020_v29  ;;  %v1026_v38 = vadd.s32 %v1020_v29, %v1016_v19 }
  0xaa   :  { %v887_v15 = vshll.u32 %v2962_v17, 30  ;;  %vm1002_vm5 = vc.u32 %v994_v59, %v998_v24  ;;  %v1004_v31 = vadd.s32 %v998_v24, %v994_v59  ;;  %v1025_v40 = vsel %vm1024_vm6, 1, %v2835_v2 }
  0xab   :  { %v1003_v37 = vsel %vm1002_vm5, 1, %v2835_v2  ;;  %v479_v45 = vand.u32 2139095040, %v2965_v26  ;;  %v1001_v46 = vshrl.u32 %v996_v8, 16  ;;  %v1027_v33 = vadd.s32 %v1025_v40, %v1019_v28 }
  0xac   :  { %v1005_v39 = vadd.s32 %v1003_v37, %v997_v23  ;;  %vm1006_vm7 = vc.u32 %v1004_v31, %v1000_v25  ;;  %v2975_v32 = vsub.s32 %v884_v62, %v887_v15  ;;  %v1021_v50 = vshrl.u32 %v1017_v20, 16 }
  0xad   :  { %v1007_v47 = vsel %vm1006_vm7, 1, %v2835_v2  ;;  %vm1028_vm8 = vc.u32 %v1026_v38, %v1022_v34  ;;  %v480_v53 = vshrl.u32 %v479_v45, 23  ;;  %v1023_v54 = vshrl.u32 %v1018_v22, 16 }
  0xae   :  { %v1009_v49 = vadd.s32 %v1007_v47, %v1005_v39  ;;  %v1029_v42 = vsel %vm1028_vm8, 1, %v2835_v2  ;;  %v890_v60 = vsub.s32 0, %v2975_v32  ;;  %v980_v62 = vsel %vm974_vm3, %v977_v27, %v979_v30 }
  0xaf   :  { %v1031_v55 = vadd.s32 %v1029_v42, %v1027_v33  ;;  %v2729_v56 = vadd.s32 4294967169, %v480_v53  ;;  %v2982_v0 = vadd.s32 %v1026_v38, %v1022_v34  ;;  %v4026_v3 = vand.u32 2147483647, %v2965_v26 }
  0xb0   :  { %v1010_v51 = vadd.s32 %v1009_v49, %v999_v36  ;;  %vm889_vm9 = vcmp.lt.s32.totalorder %v2975_v32, 0  ;;  %v1034_v11 = vmul.u32 %v2911_v48, %v980_v62  ;;  %v2993_v18 = vmul.f32 %v2872_v41, %v48_v9 }
  0xb1   :  { %v1032_v7 = vadd.s32 %v1031_v55, %v1021_v50  ;;  %v486_v58 = vadd.s32 1, %v2729_v56  ;;  %v891_v12 = vsel %vm889_vm9, %v890_v60, %v2975_v32  ;;  %v483_v59 = vand.u32 8388607, %v4026_v3 }
  0xb2   :  { %v2986_v5 = vadd.s32 %v1010_v51, %v1001_v46  ;;  %v892_v8 = vclz %v891_v12  ;;  %v169_v48 = vand.u32 2139095040, %v2993_v18  ;;  %v166_v34 = vand.u32 2147483647, %v2993_v18 }
  0xb3   :  { %v1033_v10 = vadd.s32 %v1032_v7, %v1023_v54  ;;  %vm487_vm11 = vcmp.gt.s32.totalorder %v486_v58, 0  ;;  %v484_v23 = vor.u32 8388608, %v483_v59 }
  0xb4   :  { %vm1036_vm10 = vc.u32 %v2986_v5, %v2982_v0  ;;  %v488_v14 = vsel %vm487_vm11, %v486_v58, 0  ;;  %v2736_v29 = vadd.s32 4294967294, %v892_v8  ;;  %v170_v39 = vshrl.u32 %v169_v48, 23 }
  0xb5   :  { %v1037_v13 = vadd.s32 1, %v1033_v10  ;;  %v490_v22 = vand.u32 31, %v488_v14  ;;  %v2998_v24 = vshrl.u32 %v488_v14, 5  ;;  %v3037_v60 = vshll.u32 %v484_v23, 8 }
  0xb6   :  { %vm2737_vm13 = vcmp.lt.s32.totalorder %v2736_v29, 0  ;;  %v2723_v14 = vadd.s32 4294967169, %v170_v39 }
  0xb7   :  { %v1038_v19 = vsel %vm1036_vm10, %v1037_v13, %v1033_v10  ;;  %v3000_v15 = vsub.s32 32, %v490_v22  ;;  %v493_v27 = vshll.u32 %v2837_v61, %v490_v22  ;;  %v496_v28 = vshll.u32 %v2838_v63, %v490_v22 }
  0xb8   :  { %v1039_v20 = vadd.s32 %v1038_v19, %v1034_v11  ;;  %v499_v30 = vshll.u32 %v2839_v1, %v490_v22  ;;  %v502_v31 = vshll.u32 %v2840_v4, %v490_v22  ;;  %v505_v46 = vshll.u32 %v2841_v6, %v490_v22 }
  0xb9   :  { %v494_v37 = vshrl.u32 %v2838_v63, %v3000_v15  ;;  %v497_v38 = vshrl.u32 %v2839_v1, %v3000_v15  ;;  %v500_v40 = vshrl.u32 %v2840_v4, %v3000_v15  ;;  %v503_v45 = vshrl.u32 %v2841_v6, %v3000_v15 }
  0xba   :  { %v1040_v25 = vadd.s32 536870912, %v1039_v20  ;;  %vm508_vm12 = vcmp.lt.s32.totalorder %v2998_v24, 1  ;;  %v506_v50 = vshrl.u32 %v4030_v16, %v3000_v15  ;;  %vm510_vm14 = vcmp.lt.s32.totalorder %v2998_v24, 3 }
  0xbb   :  { %v3020_v33 = vor.u32 %v494_v37, %v493_v27  ;;  %v3022_v49 = vor.u32 %v497_v38, %v496_v28  ;;  %v501_v53 = vor.u32 %v500_v40, %v499_v30  ;;  %v504_v42 = vor.u32 %v503_v45, %v502_v31 }
  0xbc   :  { %v3007_v36 = vshrl.u32 %v1040_v25, 30  ;;  %v507_v54 = vor.u32 %v506_v50, %v505_v46  ;;  %vm509_vm15 = vcmp.lt.s32.totalorder %v2998_v24, 2  ;;  %vm511_vm0 = vcmp.lt.s32.totalorder %v2998_v24, 4 }
  0xbd   :  { %v516_v55 = vsel %vm508_vm12, %v3020_v33, %v3022_v49  ;;  %v517_v56 = vsel %vm511_vm0, %v504_v42, 920167782  ;;  %v3039_v62 = vsel %vm2737_vm13, 0, %v2736_v29  ;;  %v520_v10 = vsel %vm508_vm12, %v3022_v49, %v501_v53 }
  0xbe   :  { %v1042_v47 = vshll.u32 %v3007_v36, 30  ;;  %v518_v58 = vsel %vm510_vm14, %v501_v53, %v517_v56  ;;  %v3052_v11 = vand.u32 8388607, %v166_v34  ;;  %v521_v13 = vsel %vm511_vm0, %v507_v54, 1326507024 }
  0xbf   :  { %v519_v9 = vsel %vm509_vm15, %v516_v55, %v518_v58  ;;  %v896_v8 = vsub.s32 32, %v3039_v62  ;;  %v522_v19 = vsel %vm510_vm14, %v504_v42, %v521_v13  ;;  %v900_v48 = vsub.s32 4294967266, %v3039_v62 }
  0xc0   :  { %v3027_v51 = vsub.s32 %v1039_v20, %v1042_v47  ;;  %v549_v59 = vand.u32 65535, %v519_v9  ;;  %v525_v20 = vand.u32 65535, %v3037_v60  ;;  %v550_v22 = vshrl.u32 %v519_v9, 16 }
  0xc1   :  { %v523_v25 = vsel %vm509_vm15, %v520_v10, %v522_v19  ;;  %v526_v27 = vshrl.u32 %v3037_v60, 16  ;;  %v880_v28 = vadd.s32 %v2919_v21, %v2929_v35  ;;  %v897_v37 = vshll.u32 %v2975_v32, %v3039_v62 }
  0xc2   :  { %vm1044_vm1 = vcmp.lt.s32.totalorder %v3027_v51, 0  ;;  %v1045_v7 = vsub.s32 0, %v3027_v51  ;;  %v527_v29 = vand.u32 65535, %v523_v25  ;;  %v528_v30 = vshrl.u32 %v523_v25, 16 }
  0xc3   :  { %v552_v31 = vmul.u32 %v550_v22, %v525_v20  ;;  %v3071_v38 = vadd.s32 %v2982_v0, %v2986_v5  ;;  %v553_v39 = vmul.u32 %v549_v59, %v526_v27  ;;  %v176_v40 = vadd.s32 1, %v2723_v14 }
  0xc4   :  { %v1046_v12 = vsel %vm1044_vm1, %v1045_v7, %v3027_v51  ;;  %v898_v45 = vshrl.u32 %v880_v28, %v896_v8  ;;  %v530_v46 = vmul.u32 %v528_v30, %v525_v20  ;;  %v531_v47 = vmul.u32 %v527_v29, %v526_v27 }
  0xc5   :  { %v1047_v23 = vclz %v1046_v12  ;;  %v174_v50 = vor.u32 8388608, %v3052_v11  ;;  %v3074_v42 = vadd.s32 127, %v900_v48  ;;  %v551_v35 = vmul.u32 %v549_v59, %v525_v20 }
  0xc6   :  { %v555_v54 = vshll.u32 %v552_v31, 16  ;;  %v492_v55 = vshrl.u32 %v2837_v61, %v3000_v15  ;;  %v513_v32 = vsel %vm511_vm0, %v501_v53, 2102212464  ;;  %v529_v0 = vmul.u32 %v527_v29, %v525_v20 }
  0xc7   :  { %v2739_v21 = vadd.s32 4294967294, %v1047_v23  ;;  %v533_v5 = vshll.u32 %v530_v46, 16  ;;  %v554_v56 = vmul.u32 %v550_v22, %v526_v27  ;;  %v557_v62 = vshll.u32 %v553_v39, 16 }
  0xc8   :  { %vm559_vm2 = vc.u32 %v551_v35, %v555_v54  ;;  %vm177_vm3 = vcmp.gt.s32.totalorder %v176_v40, 0  ;;  %v532_v7 = vmul.u32 %v528_v30, %v526_v27  ;;  %v535_v58 = vshll.u32 %v531_v47, 16 }
  0xc9   :  { %vm537_vm4 = vc.u32 %v529_v0, %v533_v5  ;;  %v539_v9 = vadd.s32 %v533_v5, %v529_v0  ;;  %vm2740_vm5 = vcmp.lt.s32.totalorder %v2739_v21, 0  ;;  %v560_v12 = vsel %vm559_vm2, 1, %v2835_v2 }
  0xca   :  { %v538_v10 = vsel %vm537_vm4, 1, %v2835_v2  ;;  %v561_v13 = vadd.s32 %v555_v54, %v551_v35  ;;  %v512_v15 = vsel %vm508_vm12, %v492_v55, %v3020_v33  ;;  %v178_v59 = vsel %vm177_vm3, %v176_v40, 0 }
  0xcb   :  { %v540_v53 = vadd.s32 %v538_v10, %v532_v7  ;;  %vm541_vm6 = vc.u32 %v539_v9, %v535_v58  ;;  %v514_v14 = vsel %vm510_vm14, %v3022_v49, %v513_v32  ;;  %v562_v19 = vadd.s32 %v560_v12, %v554_v56 }
  0xcc   :  { %v542_v8 = vsel %vm541_vm6, 1, %v2835_v2  ;;  %vm563_vm7 = vc.u32 %v561_v13, %v557_v62  ;;  %v3089_v20 = vsel %vm2740_vm5, 0, %v2739_v21  ;;  %v534_v22 = vshrl.u32 %v530_v46, 16 }
  0xcd   :  { %v544_v48 = vadd.s32 %v542_v8, %v540_v53  ;;  %v564_v23 = vsel %vm563_vm7, 1, %v2835_v2  ;;  %v3092_v25 = vor.u32 %v898_v45, %v897_v37  ;;  %v556_v33 = vshrl.u32 %v552_v31, 16 }
  0xce   :  { %v566_v27 = vadd.s32 %v564_v23, %v562_v19  ;;  %v180_v28 = vand.u32 31, %v178_v59  ;;  %v902_v29 = vshll.u32 %v3074_v42, 23  ;;  %v515_v49 = vsel %vm509_vm15, %v512_v15, %v514_v14 }
  0xcf   :  { %v536_v30 = vshrl.u32 %v531_v47, 16  ;;  %v545_v40 = vadd.s32 %v544_v48, %v534_v22  ;;  %v1055_v35 = vsub.s32 4294967266, %v3089_v20  ;;  %v558_v21 = vshrl.u32 %v553_v39, 16 }
  0xd0   :  { %v567_v54 = vadd.s32 %v566_v27, %v556_v33  ;;  %v3098_v46 = vsub.s32 32, %v180_v28  ;;  %v3102_v37 = vadd.s32 %v561_v13, %v557_v62  ;;  %v3104_v31 = vshrl.u32 %v178_v59, 5 }
  0xd1   :  { %v3100_v55 = vadd.s32 %v545_v40, %v536_v30  ;;  %v183_v45 = vshll.u32 %v2837_v61, %v180_v28  ;;  %v186_v47 = vshll.u32 %v2838_v63, %v180_v28  ;;  %v189_v32 = vshll.u32 %v2839_v1, %v180_v28 }
  0xd2   :  { %v568_v42 = vadd.s32 %v567_v54, %v558_v21  ;;  %v184_v24 = vshrl.u32 %v2838_v63, %v3098_v46  ;;  %v187_v39 = vshrl.u32 %v2839_v1, %v3098_v46  ;;  %v190_v0 = vshrl.u32 %v2840_v4, %v3098_v46 }
  0xd3   :  { %vm571_vm8 = vc.u32 %v3100_v55, %v3102_v37  ;;  %v192_v5 = vshll.u32 %v2840_v4, %v180_v28  ;;  %v193_v58 = vshrl.u32 %v2841_v6, %v3098_v46  ;;  %v569_v9 = vmul.u32 %v3037_v60, %v515_v49 }
  0xd4   :  { %v572_v56 = vadd.s32 1, %v568_v42  ;;  %v3118_v62 = vor.u32 %v184_v24, %v183_v45  ;;  %v3120_v7 = vor.u32 %v187_v39, %v186_v47  ;;  %v3125_v10 = vor.u32 %v190_v0, %v189_v32  ;;  %v69_v0 = vpop.permute.xlu1 %68 }
  0xd5   :  { %v195_v12 = vshll.u32 %v2841_v6, %v180_v28  ;;  %v196_v13 = vshrl.u32 %v4030_v16, %v3098_v46  ;;  %v1056_v15 = vadd.s32 127, %v1055_v35  ;;  %v194_v59 = vor.u32 %v193_v58, %v192_v5 }
  0xd6   :  { %v573_v53 = vsel %vm571_vm8, %v572_v56, %v568_v42  ;;  %v3132_v14 = vshll.u32 %v174_v50, 8  ;;  %v3134_v8 = vor.u32 4788187, %v902_v29  ;;  %vm198_vm9 = vcmp.lt.s32.totalorder %v3104_v31, 1 }
  0xd7   :  { %v574_v19 = vadd.s32 %v573_v53, %v569_v9  ;;  %v197_v22 = vor.u32 %v196_v13, %v195_v12  ;;  %v906_v60 = vcvt.s32.f32 %v3092_v25  ;;  %v1051_v48 = vsub.s32 32, %v3089_v20 }
  0xd8   :  { %vm201_vm10 = vcmp.lt.s32.totalorder %v3104_v31, 4  ;;  %v206_v23 = vsel %vm198_vm9, %v3118_v62, %v3120_v7  ;;  %vm200_vm11 = vcmp.lt.s32.totalorder %v3104_v31, 3  ;;  %v210_v33 = vsel %vm198_vm9, %v3120_v7, %v3125_v10 }
  0xd9   :  { %v575_v11 = vadd.s32 536870912, %v574_v19  ;;  %v207_v50 = vsel %vm201_vm10, %v194_v59, 920167782  ;;  %v1057_v27 = vshll.u32 %v1056_v15, 23  ;;  %vm199_vm12 = vcmp.lt.s32.totalorder %v3104_v31, 2 }
  0xda   :  { %v208_v28 = vsel %vm200_vm11, %v3125_v10, %v207_v50  ;;  %v211_v29 = vsel %vm201_vm10, %v197_v22, 1326507024  ;;  %v215_v35 = vand.u32 65535, %v3132_v14  ;;  %v216_v54 = vshrl.u32 %v3132_v14, 16 }
  0xdb   :  { %v3157_v49 = vshrl.u32 %v575_v11, 30  ;;  %v209_v30 = vsel %vm199_vm12, %v206_v23, %v208_v28  ;;  %v212_v40 = vsel %vm200_vm11, %v194_v59, %v211_v29  ;;  %v904_v24 = vand.u32 2147483647, %v3134_v8 }
  0xdc   :  { %v213_v21 = vsel %vm199_vm12, %v210_v33, %v212_v40  ;;  %v239_v45 = vand.u32 65535, %v209_v30  ;;  %v240_v42 = vshrl.u32 %v209_v30, 16  ;;  %v1052_v5 = vshll.u32 %v3027_v51, %v3089_v20 }
  0xdd   :  { %v577_v47 = vshll.u32 %v3157_v49, 30  ;;  %v217_v39 = vand.u32 65535, %v213_v21  ;;  %v218_v32 = vshrl.u32 %v213_v21, 16  ;;  %v1053_v56 = vshrl.u32 %v3071_v38, %v1051_v48 }
  0xde   :  { %v242_v58 = vmul.u32 %v240_v42, %v215_v35  ;;  %v243_v9 = vmul.u32 %v239_v45, %v216_v54  ;;  %v1058_v12 = vor.u32 4788187, %v1057_v27  ;;  %v241_v59 = vmul.u32 %v239_v45, %v215_v35 }
  0xdf   :  { %v3172_v13 = vsub.s32 %v574_v19, %v577_v47  ;;  %v220_v15 = vmul.u32 %v218_v32, %v215_v35  ;;  %v221_v53 = vmul.u32 %v217_v39, %v216_v54  ;;  %v244_v22 = vmul.u32 %v240_v42, %v216_v54 }
  0xe0   :  { %v245_v8 = vshll.u32 %v242_v58, 16  ;;  %v3175_v23 = vmul.f32 %v2872_v41, %v69_v0  ;;  %v219_v51 = vmul.u32 %v217_v39, %v215_v35  ;;  %v222_v38 = vmul.u32 %v218_v32, %v216_v54 }
  0xe1   :  { %vm579_vm13 = vcmp.lt.s32.totalorder %v3172_v13, 0  ;;  %v580_v11 = vsub.s32 0, %v3172_v13  ;;  %v223_v20 = vshll.u32 %v220_v15, 16  ;;  %v225_v48 = vshll.u32 %v221_v53, 16 }
  0xe2   :  { %v247_v50 = vshll.u32 %v243_v9, 16  ;;  %vm249_vm14 = vc.u32 %v241_v59, %v245_v8  ;;  %v251_v30 = vadd.s32 %v245_v8, %v241_v59  ;;  %v1054_v21 = vor.u32 %v1053_v56, %v1052_v5 }
  0xe3   :  { %v581_v19 = vsel %vm579_vm13, %v580_v11, %v3172_v13  ;;  %vm227_vm15 = vc.u32 %v219_v51, %v223_v20  ;;  %v229_v33 = vadd.s32 %v223_v20, %v219_v51  ;;  %v250_v27 = vsel %vm249_vm14, 1, %v2835_v2 }
  0xe4   :  { %v582_v28 = vclz %v581_v19  ;;  %v228_v29 = vsel %vm227_vm15, 1, %v2835_v2  ;;  %v252_v40 = vadd.s32 %v250_v27, %v244_v22  ;;  %v182_v35 = vshrl.u32 %v2837_v61, %v3098_v46 }
  0xe5   :  { %v230_v45 = vadd.s32 %v228_v29, %v222_v38  ;;  %vm231_vm0 = vc.u32 %v229_v33, %v225_v48  ;;  %v203_v54 = vsel %vm201_vm10, %v3125_v10, 2102212464  ;;  %v224_v42 = vshrl.u32 %v220_v15, 16 }
  0xe6   :  { %v232_v47 = vsel %vm231_vm0, 1, %v2835_v2  ;;  %vm253_vm1 = vc.u32 %v251_v30, %v247_v50  ;;  %v2730_v39 = vadd.s32 4294967294, %v582_v28  ;;  %v634_v59 = vand.u32 2139095040, %v3175_v23 }
  0xe7   :  { %v234_v32 = vadd.s32 %v232_v47, %v230_v45  ;;  %v254_v0 = vsel %vm253_vm1, 1, %v2835_v2  ;;  %v1059_v5 = vand.u32 2147483647, %v1058_v12  ;;  %v202_v46 = vsel %vm198_vm9, %v182_v35, %v3118_v62 }
  0xe8   :  { %v246_v56 = vshrl.u32 %v242_v58, 16  ;;  %v256_v22 = vadd.s32 %v254_v0, %v252_v40  ;;  %v204_v10 = vsel %vm200_vm11, %v3120_v7, %v203_v54  ;;  %v226_v15 = vshrl.u32 %v221_v53, 16 }
  0xe9   :  { %v235_v8 = vadd.s32 %v234_v32, %v224_v42  ;;  %v635_v11 = vshrl.u32 %v634_v59, 23  ;;  %v1061_v51 = vcvt.s32.f32 %v1054_v21  ;;  %v248_v20 = vshrl.u32 %v243_v9, 16  ;;  %v55_v9 = vpop.permute.xlu0 %54  ;;  %v3209_v42 = vpop.permute.xlu2 %2787 }
  0xea   :  { %v257_v38 = vadd.s32 %v256_v22, %v246_v56  ;;  %v4025_v48 = vand.u32 2147483647, %v3175_v23  ;;  %vm2731_vm2 = vcmp.lt.s32.totalorder %v2730_v39, 0  ;;  %v255_v19 = vadd.s32 %v251_v30, %v247_v50 }
  0xeb   :  { %v236_v12 = vadd.s32 %v235_v8, %v226_v15  ;;  %v2732_v33 = vadd.s32 4294967169, %v635_v11  ;;  %v907_v62 = vmul.f32 %v906_v60, %v904_v24  ;;  %v1062_v58 = vmul.f32 %v1061_v51, %v1059_v5 }
  0xec   :  { %v205_v27 = vsel %vm199_vm12, %v202_v46, %v204_v10  ;;  %v258_v7 = vadd.s32 %v257_v38, %v248_v20  ;;  %v585_v28 = vsel %vm2731_vm2, 0, %v2730_v39  ;;  %v638_v21 = vand.u32 8388607, %v4025_v48 }
  0xed   :  { %vm261_vm3 = vc.u32 %v236_v12, %v255_v19  ;;  %v641_v53 = vadd.s32 1, %v2732_v33  ;;  %v259_v40 = vmul.u32 %v3132_v14, %v205_v27  ;;  %v908_v50 = vxor.u32 2147483648, %v907_v62 }
  0xee   :  { %v262_v29 = vadd.s32 1, %v258_v7  ;;  %v1063_v30 = vxor.u32 2147483648, %v1062_v58  ;;  %v590_v24 = vsub.s32 4294967266, %v585_v28  ;;  %v3205_v45 = vmul.f32 %v2872_v41, %v55_v9 }
  0xef   :  { %vm642_vm4 = vcmp.gt.s32.totalorder %v641_v53, 0  ;;  %vm788_vm5 = vcmp.lt.s32.totalorder %v2875_v43, 0  ;;  %v586_v54 = vsub.s32 32, %v585_v28  ;;  %vm943_vm6 = vcmp.lt.s32.totalorder %v2882_v52, 0 }
  0xf0   :  { %v263_v25 = vsel %vm261_vm3, %v262_v29, %v258_v7  ;;  %v643_v60 = vsel %vm642_vm4, %v641_v53, 0  ;;  %v639_v47 = vor.u32 8388608, %v638_v21  ;;  %v3213_v32 = vsel %vm788_vm5, %v908_v50, %v907_v62 }
  0xf1   :  { %v264_v35 = vadd.s32 %v263_v25, %v259_v40  ;;  %v645_v31 = vand.u32 31, %v643_v60  ;;  %v3217_v0 = vsel %vm943_vm6, %v1063_v30, %v1062_v58  ;;  %v570_v41 = vadd.s32 %v3102_v37, %v3100_v55 }
  0xf2   :  { %v2789_v59 = vunpack.i.l.bf16 %v3209_v42  ;;  %v587_v5 = vshll.u32 %v3172_v13, %v585_v28  ;;  %v591_v46 = vadd.s32 127, %v590_v24  ;;  %v4029_v22 = vand.u32 2147483647, %v3205_v45 }
  0xf3   :  { %v265_v14 = vadd.s32 536870912, %v264_v35  ;;  %v646_v39 = vsub.s32 32, %v645_v31  ;;  %v588_v10 = vshrl.u32 %v570_v41, %v586_v54  ;;  %v260_v51 = vadd.s32 %v255_v19, %v236_v12 }
  0xf4   :  { %v3228_v55 = vshll.u32 %v639_v47, 8  ;;  %vm168_vm7 = vcmp.lt.s32.totalorder %v2993_v18, 0  ;;  %v648_v37 = vshll.u32 %v2837_v61, %v645_v31  ;;  %v651_v13 = vshll.u32 %v2838_v63, %v645_v31 }
  0xf5   :  { %v266_v56 = vshrl.u32 %v265_v14, 30  ;;  %v649_v15 = vshrl.u32 %v2838_v63, %v646_v39  ;;  %v652_v8 = vshrl.u32 %v2839_v1, %v646_v39  ;;  %v658_v11 = vshrl.u32 %v2841_v6, %v646_v39 }
  0xf6   :  { %v655_v38 = vshrl.u32 %v2840_v4, %v646_v39  ;;  %v657_v33 = vshll.u32 %v2840_v4, %v645_v31  ;;  %v661_v62 = vshrl.u32 %v4030_v16, %v646_v39  ;;  %v592_v58 = vshll.u32 %v591_v46, 23 }
  0xf7   :  { %v267_v20 = vshll.u32 %v266_v56, 30  ;;  %v3235_v7 = vshrl.u32 %v643_v60, 5  ;;  %v654_v12 = vshll.u32 %v2839_v1, %v645_v31  ;;  %v650_v19 = vor.u32 %v649_v15, %v648_v37 }
  0xf8   :  { %v653_v53 = vor.u32 %v652_v8, %v651_v13  ;;  %v659_v28 = vor.u32 %v658_v11, %v657_v33  ;;  %v660_v29 = vshll.u32 %v2841_v6, %v645_v31  ;;  %v3239_v9 = vor.u32 %v588_v10, %v587_v5 }
  0xf9   :  { %v268_v27 = vsub.s32 %v264_v35, %v267_v20  ;;  %vm3243_vm8 = vcmp.le.f32.partialorder %v166_v34, 0.7853982  ;;  %v656_v50 = vor.u32 %v655_v38, %v654_v12  ;;  %v680_v25 = vand.u32 65535, %v3228_v55 }
  0xfa   :  { %v662_v30 = vor.u32 %v661_v62, %v660_v29  ;;  %v681_v60 = vshrl.u32 %v3228_v55, 16  ;;  %v324_v24 = vand.u32 2139095040, %v3205_v45  ;;  %v290_v31 = vsub.s32 4, %v266_v56 }
  0xfb   :  { %vm269_vm9 = vcmp.lt.s32.totalorder %v268_v27, 0  ;;  %v270_v21 = vsub.s32 0, %v268_v27  ;;  %vm663_vm10 = vcmp.lt.s32.totalorder %v3235_v7, 1  ;;  %vm666_vm11 = vcmp.lt.s32.totalorder %v3235_v7, 4 }
  0xfc   :  { %v3252_v34 = vor.u32 4788187, %v592_v58  ;;  %v671_v14 = vsel %vm663_vm10, %v650_v19, %v653_v53  ;;  %v672_v47 = vsel %vm666_vm11, %v659_v28, 920167782  ;;  %v596_v41 = vcvt.s32.f32 %v3239_v9 }
  0xfd   :  { %v271_v35 = vsel %vm269_vm9, %v270_v21, %v268_v27  ;;  %v647_v5 = vshrl.u32 %v2837_v61, %v646_v39  ;;  %vm665_vm12 = vcmp.lt.s32.totalorder %v3235_v7, 3  ;;  %v675_v46 = vsel %vm663_vm10, %v653_v53, %v656_v50 }
  0xfe   :  { %v272_v54 = vclz %v271_v35  ;;  %vm664_vm13 = vcmp.lt.s32.totalorder %v3235_v7, 2  ;;  %v673_v15 = vsel %vm665_vm12, %v656_v50, %v672_v47  ;;  %v676_v8 = vsel %vm666_vm11, %v662_v30, 1326507024 }
  0xff   :  { %v291_v11 = vsel %vm168_vm7, %v290_v31, %v266_v56  ;;  %v668_v20 = vsel %vm666_vm11, %v656_v50, 2102212464  ;;  %v674_v38 = vsel %vm664_vm13, %v671_v14, %v673_v15  ;;  %v677_v39 = vsel %vm665_vm12, %v659_v28, %v676_v8 }
 0x100   :  { %v2724_v10 = vadd.s32 4294967294, %v272_v54  ;;  %v678_v37 = vsel %vm664_vm13, %v675_v46, %v677_v39  ;;  %v704_v13 = vand.u32 65535, %v674_v38  ;;  %v705_v33 = vshrl.u32 %v674_v38, 16 }
 0x101   :  { %v682_v58 = vand.u32 65535, %v678_v37  ;;  %v683_v12 = vshrl.u32 %v678_v37, 16  ;;  %v325_v29 = vshrl.u32 %v324_v24, 23  ;;  %v293_v56 = vsel %vm3243_vm8, 0, %v291_v11 }
 0x102   :  { %vm2725_vm14 = vcmp.lt.s32.totalorder %v2724_v10, 0  ;;  %v667_v50 = vsel %vm663_vm10, %v647_v5, %v650_v19  ;;  %v669_v28 = vsel %vm665_vm12, %v653_v53, %v668_v20  ;;  %v707_v46 = vmul.u32 %v705_v33, %v680_v25 }
 0x103   :  { %v275_v62 = vsel %vm2725_vm14, 0, %v2724_v10  ;;  %v685_v31 = vmul.u32 %v683_v12, %v680_v25  ;;  %v686_v54 = vmul.u32 %v682_v58, %v681_v60  ;;  %v708_v10 = vmul.u32 %v704_v13, %v681_v60 }
 0x104   :  { %v276_v21 = vsub.s32 32, %v275_v62  ;;  %v280_v30 = vsub.s32 4294967266, %v275_v62  ;;  %v277_v35 = vshll.u32 %v268_v27, %v275_v62  ;;  %v684_v15 = vmul.u32 %v682_v58, %v680_v25 }
 0x105   :  { %v688_v24 = vshll.u32 %v685_v31, 16  ;;  %v706_v8 = vmul.u32 %v704_v13, %v680_v25  ;;  %v2726_v38 = vadd.s32 4294967169, %v325_v29  ;;  %v687_v11 = vmul.u32 %v683_v12, %v681_v60 }
 0x106   :  { %v278_v14 = vshrl.u32 %v260_v51, %v276_v21  ;;  %v281_v47 = vadd.s32 127, %v280_v30  ;;  %v710_v48 = vshll.u32 %v707_v46, 16  ;;  %v690_v3 = vshll.u32 %v686_v54, 16 }
 0x107   :  { %vm692_vm15 = vc.u32 %v684_v15, %v688_v24  ;;  %v694_v27 = vadd.s32 %v688_v24, %v684_v15  ;;  %v709_v19 = vmul.u32 %v705_v33, %v681_v60  ;;  %v712_v51 = vshll.u32 %v708_v10, 16 }
 0x108   :  { %v279_v39 = vor.u32 %v278_v14, %v277_v35  ;;  %v282_v37 = vshll.u32 %v281_v47, 23  ;;  %v693_v20 = vsel %vm692_vm15, 1, %v2835_v2  ;;  %vm714_vm1 = vc.u32 %v706_v8, %v710_v48 }
 0x109   :  { %v695_v62 = vadd.s32 %v693_v20, %v687_v11  ;;  %vm696_vm0 = vc.u32 %v694_v27, %v690_v3  ;;  %v716_v58 = vadd.s32 %v710_v48, %v706_v8  ;;  %v715_v13 = vsel %vm714_vm1, 1, %v2835_v2 }
 0x10a   :  { %v283_v5 = vor.u32 4788187, %v282_v37  ;;  %v286_v53 = vcvt.s32.f32 %v279_v39  ;;  %v697_v25 = vsel %vm696_vm0, 1, %v2835_v2  ;;  %v331_v12 = vadd.s32 1, %v2726_v38 }
 0x10b   :  { %v689_v29 = vshrl.u32 %v685_v31, 16  ;;  %v699_v30 = vadd.s32 %v697_v25, %v695_v62  ;;  %v717_v35 = vadd.s32 %v715_v13, %v709_v19  ;;  %vm718_vm2 = vc.u32 %v716_v58, %v712_v51 }
 0x10c   :  { %v284_v21 = vand.u32 2147483647, %v283_v5  ;;  %v691_v33 = vshrl.u32 %v686_v54, 16  ;;  %v719_v14 = vsel %vm718_vm2, 1, %v2835_v2  ;;  %vm332_vm3 = vcmp.gt.s32.totalorder %v331_v12, 0 }
 0x10d   :  { %v700_v47 = vadd.s32 %v699_v30, %v689_v29  ;;  %v711_v15 = vshrl.u32 %v707_v46, 16  ;;  %v721_v3 = vadd.s32 %v719_v14, %v717_v35  ;;  %v333_v24 = vsel %vm332_vm3, %v331_v12, 0 }
 0x10e   :  { %v287_v60 = vmul.f32 %v286_v53, %v284_v21  ;;  %v594_v48 = vand.u32 2147483647, %v3252_v34  ;;  %v670_v39 = vsel %vm664_vm13, %v667_v50, %v669_v28  ;;  %v335_v38 = vand.u32 31, %v333_v24 }
 0x10f   :  { %v3285_v31 = vadd.s32 %v700_v47, %v691_v33  ;;  %v713_v37 = vshrl.u32 %v708_v10, 16  ;;  %v722_v11 = vadd.s32 %v721_v3, %v711_v15  ;;  %v328_v54 = vand.u32 8388607, %v4029_v22 }
 0x110   :  { %v288_v8 = vxor.u32 2147483648, %v287_v60  ;;  %v310_v46 = vadd.s32 3, %v293_v56  ;;  %v3291_v19 = vadd.s32 %v716_v58, %v712_v51  ;;  %v3293_v5 = vsub.s32 32, %v335_v38 }
 0x111   :  { %v3300_v34 = vand.u32 3, %v293_v56  ;;  %v723_v50 = vadd.s32 %v722_v11, %v713_v37  ;;  %v724_v28 = vmul.u32 %v3228_v55, %v670_v39  ;;  %v3307_v53 = vshrl.u32 %v333_v24, 5 }
 0x112   :  { %v289_v27 = vsel %vm168_vm7, %v288_v8, %v287_v60  ;;  %vm726_vm4 = vc.u32 %v3285_v31, %v3291_v19  ;;  %v338_v20 = vshll.u32 %v2837_v61, %v335_v38  ;;  %v339_v40 = vshrl.u32 %v2838_v63, %v3293_v5 }
 0x113   :  { %v3298_v7 = vsel %vm3243_vm8, %v2993_v18, %v289_v27  ;;  %v727_v51 = vadd.s32 1, %v723_v50  ;;  %v342_v56 = vshrl.u32 %v2839_v1, %v3293_v5  ;;  %v345_v55 = vshrl.u32 %v2840_v4, %v3293_v5 }
 0x114   :  { %v294_v10 = vmul.f32 %v3298_v7, %v3298_v7  ;;  %v341_v21 = vshll.u32 %v2838_v63, %v335_v38  ;;  %v344_v25 = vshll.u32 %v2839_v1, %v335_v38  ;;  %v347_v12 = vshll.u32 %v2840_v4, %v335_v38 }
 0x115   :  { %v728_v13 = vsel %vm726_vm4, %v727_v51, %v723_v50  ;;  %v348_v29 = vshrl.u32 %v2841_v6, %v3293_v5  ;;  %v350_v30 = vshll.u32 %v2841_v6, %v335_v38  ;;  %v351_v14 = vshrl.u32 %v4030_v16, %v3293_v5 }
 0x116   :  { %v295_v62 = vmul.f32 -0.001358992, %v294_v10  ;;  %v302_v58 = vmul.f32 -0.00019511016, %v294_v10  ;;  %v729_v33 = vadd.s32 %v728_v13, %v724_v28  ;;  %v3324_v47 = vor.u32 %v339_v40, %v338_v20 }
 0x117   :  { %v3326_v15 = vor.u32 %v342_v56, %v341_v21  ;;  %v3328_v3 = vor.u32 %v345_v55, %v344_v25  ;;  %v349_v24 = vor.u32 %v348_v29, %v347_v12  ;;  %v352_v11 = vor.u32 %v351_v14, %v350_v30 }
 0x118   :  { %v296_v35 = vadd.f32 0.041655596, %v295_v62  ;;  %v303_v60 = vadd.f32 0.008332121, %v302_v58  ;;  %v730_v37 = vadd.s32 536870912, %v729_v33  ;;  %v3332_v38 = vmul.f32 %v596_v41, %v594_v48 }
 0x119   :  { %v311_v27 = vand.u32 3, %v310_v46  ;;  %v329_v50 = vor.u32 8388608, %v328_v54  ;;  %vm353_vm7 = vcmp.lt.s32.totalorder %v3307_v53, 1  ;;  %vm356_vm8 = vcmp.lt.s32.totalorder %v3307_v53, 4 }
 0x11a   :  { %v297_v8 = vmul.f32 %v296_v35, %v294_v10  ;;  %v304_v39 = vmul.f32 %v303_v60, %v294_v10  ;;  %v3335_v51 = vshrl.u32 %v730_v37, 30  ;;  %vm1569_vm9 = vcmp.eq.s32.totalorder %v3300_v34, 0 }
 0x11b   :  { %vm1572_vm10 = vcmp.eq.s32.totalorder %v3300_v34, 2  ;;  %vm355_vm11 = vcmp.lt.s32.totalorder %v3307_v53, 3  ;;  %v361_v9 = vsel %vm353_vm7, %v3324_v47, %v3326_v15  ;;  %v362_v41 = vsel %vm356_vm8, %v349_v24, 920167782 }
 0x11c   :  { %v298_v28 = vadd.f32 -0.4999988, %v297_v8  ;;  %v305_v20 = vadd.f32 -0.16666654, %v304_v39  ;;  %v366_v48 = vsel %vm356_vm8, %v352_v11, 1326507024  ;;  %v365_v56 = vsel %vm353_vm7, %v3326_v15, %v3328_v3 }
 0x11d   :  { %vm1568_vm12 = vcmp.lt.s32.totalorder %v3300_v34, 2  ;;  %v732_v40 = vshll.u32 %v3335_v51, 30  ;;  %vm309_vm13 = vweird.f32 %v2993_v18  ;;  %vm354_vm14 = vcmp.lt.s32.totalorder %v3307_v53, 2 }
 0x11e   :  { %v299_v54 = vmul.f32 %v298_v28, %v294_v10  ;;  %v306_v46 = vmul.f32 %v305_v20, %v294_v10  ;;  %v363_v55 = vsel %vm355_vm11, %v3328_v3, %v362_v41  ;;  %v367_v10 = vsel %vm355_vm11, %v349_v24, %v366_v48 }
 0x11f   :  { %v3362_v62 = vshll.u32 %v329_v50, 8  ;;  %v3364_v25 = vsub.s32 %v729_v33, %v732_v40  ;;  %v364_v13 = vsel %vm354_vm14, %v361_v9, %v363_v55  ;;  %vm312_vm15 = vcmp.lt.s32.totalorder %v311_v27, 2 }
 0x120   :  { %v300_v58 = vadd.f32 1.0, %v299_v54  ;;  %v307_v21 = vadd.f32 1.0, %v306_v46  ;;  %vm313_vm0 = vcmp.eq.s32.totalorder %v311_v27, 0  ;;  %v368_v12 = vsel %vm354_vm14, %v365_v56, %v367_v10 }
 0x121   :  { %v395_v29 = vshrl.u32 %v364_v13, 16  ;;  %vm734_vm1 = vcmp.lt.s32.totalorder %v3364_v25, 0  ;;  %v735_v60 = vsub.s32 0, %v3364_v25  ;;  %vm316_vm2 = vcmp.eq.s32.totalorder %v311_v27, 2 }
 0x122   :  { %v308_v30 = vmul.f32 %v307_v21, %v3298_v7  ;;  %v317_v35 = vxor.u32 2147483648, %v300_v58  ;;  %v370_v33 = vand.u32 65535, %v3362_v62  ;;  %v372_v14 = vand.u32 65535, %v368_v12 }
 0x123   :  { %v373_v24 = vshrl.u32 %v368_v12, 16  ;;  %v736_v37 = vsel %vm734_vm1, %v735_v60, %v3364_v25  ;;  %v371_v11 = vshrl.u32 %v3362_v62, 16  ;;  %v394_v20 = vand.u32 65535, %v364_v13 }
 0x124   :  { %v314_v8 = vxor.u32 2147483648, %v308_v30  ;;  %v318_v39 = vsel %vm316_vm2, %v317_v35, %v308_v30  ;;  %v737_v50 = vclz %v736_v37  ;;  %v3376_v7 = vmul.u32 %v395_v29, %v370_v33 }
 0x125   :  { %v375_v28 = vmul.u32 %v373_v24, %v370_v33  ;;  %v1574_v48 = vsel %vm1572_vm10, %v317_v35, %v308_v30  ;;  %v376_v54 = vmul.u32 %v372_v14, %v371_v11  ;;  %v374_v13 = vmul.u32 %v372_v14, %v370_v33 }
 0x126   :  { %v315_v9 = vsel %vm313_vm0, %v300_v58, %v314_v8  ;;  %v1571_v41 = vsel %vm1569_vm9, %v300_v58, %v314_v8  ;;  %v2733_v56 = vadd.s32 4294967294, %v737_v50  ;;  %v377_v12 = vmul.u32 %v373_v24, %v371_v11  ;;  %v97_v58 = vpop.permute.xlu1 %96  ;;  %v2808_v24 = vld [vmem:[%s4023_s1] ss:$0 sm:$0xff]  ;;  %s2844_s1 = smov [#allocation3]  }
 0x127   :  { %v319_v46 = vsel %vm312_vm15, %v315_v9, %v318_v39  ;;  %v1575_v40 = vsel %vm1568_vm12, %v1571_v41, %v1574_v48  ;;  %v378_v55 = vshll.u32 %v375_v28, 16  ;;  %v398_v34 = vmul.u32 %v394_v20, %v371_v11  ;;  %v90_v41 = vpop.permute.xlu0 %89  ;;  %s2708_s15 = sshll.u32 %s2844_s1, 4  ;;  %s2709_s15 = int_to_ptr.vmem [resolvable:$true] %s2708_s15 }
 0x128   :  { %v320_v10 = vsel %vm309_vm13, nan, %v319_v46  ;;  %v1576_v21 = vsel %vm309_vm13, nan, %v1575_v40  ;;  %vm2734_vm3 = vcmp.lt.s32.totalorder %v2733_v56, 0  ;;  %v380_v60 = vshll.u32 %v376_v54, 16 }
 0x129   :  { %v3392_v30 = vmul.f32 %v2789_v59, %v320_v10  ;;  %v2655_v27 = vmul.f32 %v2789_v59, %v1576_v21  ;;  %v740_v35 = vsel %vm2734_vm3, 0, %v2733_v56  ;;  %vm382_vm4 = vc.u32 %v374_v13, %v378_v55 }
 0x12a   :  { %v384_v8 = vadd.s32 %v378_v55, %v374_v13  ;;  %v725_v18 = vadd.s32 %v3291_v19, %v3285_v31  ;;  %v745_v39 = vsub.s32 4294967266, %v740_v35  ;;  %v383_v14 = vsel %vm382_vm4, 1, %v2835_v2 }
 0x12b   :  { %v3402_v37 = vmul.f32 %v2808_v24, %v97_v58  ;;  %2671 = vrot.lane.b32.xlu0 %v2655_v27, %s2843_s14  ;;  %v385_v59 = vadd.s32 %v383_v14, %v377_v12  ;;  %v396_v50 = vmul.u32 %v394_v20, %v370_v33  ;;  %v400_v9 = vshll.u32 %v3376_v7, 16 }
 0x12c   :  { %vm386_vm9 = vc.u32 %v384_v8, %v380_v60  ;;  %v746_v48 = vadd.s32 127, %v745_v39  ;;  %v379_v31 = vshrl.u32 %v375_v28, 16  ;;  %v399_v46 = vmul.u32 %v395_v29, %v371_v11 }
 0x12d   :  { %v387_v19 = vsel %vm386_vm9, 1, %v2835_v2  ;;  %v402_v56 = vshll.u32 %v398_v34, 16  ;;  %vm404_vm10 = vc.u32 %v396_v50, %v400_v9  ;;  %v406_v55 = vadd.s32 %v400_v9, %v396_v50 }
 0x12e   :  { %v389_v40 = vadd.s32 %v387_v19, %v385_v59  ;;  %vm3409_vm12 = vcmp.le.f32.partialorder %v786_v44, 0.7853982  ;;  %v741_v21 = vsub.s32 32, %v740_v35  ;;  %v337_v33 = vshrl.u32 %v2837_v61, %v3293_v5 }
 0x12f   :  { %v405_v20 = vsel %vm404_vm10, 1, %v2835_v2  ;;  %v3416_v28 = vmul.f32 %v2808_v24, %v90_v41  ;;  %vm3420_vm13 = vcmp.le.f32.partialorder %v941_v57, 0.7853982  ;;  %v358_v44 = vsel %vm356_vm8, %v3328_v3, 2102212464 }
 0x130   :  { %v390_v11 = vadd.s32 %v389_v40, %v379_v31  ;;  %v407_v13 = vadd.s32 %v405_v20, %v399_v46  ;;  %vm408_vm15 = vc.u32 %v406_v55, %v402_v56  ;;  %v747_v12 = vshll.u32 %v746_v48, 23 }
 0x131   :  { %v381_v58 = vshrl.u32 %v376_v54, 16  ;;  %v409_v5 = vsel %vm408_vm15, 1, %v2835_v2  ;;  %v4028_v27 = vand.u32 2147483647, %v3402_v37  ;;  %v357_v57 = vsel %vm353_vm7, %v337_v33, %v3324_v47 }
 0x132   :  { %v401_v60 = vshrl.u32 %v3376_v7, 16  ;;  %v411_v8 = vadd.s32 %v409_v5, %v407_v13  ;;  %v1254_v39 = vand.u32 2139095040, %v3402_v37  ;;  %v743_v14 = vshrl.u32 %v725_v18, %v741_v21 }
 0x133   :  { %v359_v3 = vsel %vm355_vm11, %v3326_v15, %v358_v44  ;;  %v391_v24 = vadd.s32 %v390_v11, %v381_v58  ;;  %v1099_v54 = vand.u32 2139095040, %v3416_v28  ;;  %v742_v59 = vshll.u32 %v3364_v25, %v740_v35 }
 0x134   :  { %v403_v50 = vshrl.u32 %v398_v34, 16  ;;  %v412_v9 = vadd.s32 %v411_v8, %v401_v60  ;;  %v1255_v41 = vshrl.u32 %v1254_v39, 23  ;;  %v748_v48 = vor.u32 4788187, %v747_v12 }
 0x135   :  { %v410_v47 = vadd.s32 %v406_v55, %v402_v56  ;;  %v1258_v7 = vand.u32 8388607, %v4028_v27  ;;  %v1100_v31 = vshrl.u32 %v1099_v54, 23  ;;  %v360_v18 = vsel %vm354_vm14, %v357_v57, %v359_v3 }
 0x136   :  { %v413_v19 = vadd.s32 %v412_v9, %v403_v50  ;;  %v2744_v46 = vadd.s32 4294967169, %v1255_v41  ;;  %v4027_v15 = vand.u32 2147483647, %v3416_v28  ;;  %vm478_vm7 = vcmp.lt.s32.totalorder %v2965_v26, 0 }
 0x137   :  { %v744_v40 = vor.u32 %v743_v14, %v742_v59  ;;  %vm416_vm8 = vc.u32 %v391_v24, %v410_v47  ;;  %v2741_v25 = vadd.s32 4294967169, %v1100_v31  ;;  %v3449_v34 = vsel %vm3409_vm12, %v2875_v43, %v3213_v32 }
 0x138   :  { %v598_v35 = vxor.u32 2147483648, %v3332_v38  ;;  %v417_v56 = vadd.s32 1, %v413_v19  ;;  %v1261_v53 = vadd.s32 1, %v2744_v46  ;;  %v3456_v55 = vsel %vm3420_vm13, %v2882_v52, %v3217_v0 }
 0x139   :  { %v749_v21 = vand.u32 2147483647, %v748_v48  ;;  %v414_v33 = vmul.u32 %v3362_v62, %v360_v18  ;;  %v1259_v20 = vor.u32 8388608, %v1258_v7  ;;  %v3461_v32 = vand.u32 8388607, %v4027_v15 }
 0x13a   :  { %v418_v44 = vsel %vm416_vm8, %v417_v56, %v413_v19  ;;  %vm1262_vm11 = vcmp.gt.s32.totalorder %v1261_v53, 0  ;;  %v1106_v11 = vadd.s32 1, %v2741_v25  ;;  %v3465_v13 = vmul.f32 %v3449_v34, %v3449_v34 }
 0x13b   :  { %v751_v12 = vcvt.s32.f32 %v744_v40  ;;  %v419_v58 = vadd.s32 %v418_v44, %v414_v33  ;;  %v1263_v5 = vsel %vm1262_vm11, %v1261_v53, 0  ;;  %v3469_v0 = vmul.f32 %v3456_v55, %v3456_v55 }
 0x13c   :  { %v3474_v62 = vsel %vm478_vm7, %v598_v35, %v3332_v38  ;;  %v1265_v60 = vand.u32 31, %v1263_v5  ;;  %v3479_v39 = vadd.s32 %v410_v47, %v391_v24  ;;  %v3481_v3 = vshll.u32 %v1259_v20, 8 }
 0x13d   :  { %v3477_v8 = vmul.f32 %v751_v12, %v749_v21  ;;  %v420_v14 = vadd.s32 536870912, %v419_v58  ;;  %v3483_v54 = vshrl.u32 %v1263_v5, 5  ;;  %v1104_v50 = vor.u32 8388608, %v3461_v32 }
 0x13e   :  { %v1266_v59 = vsub.s32 32, %v1265_v60  ;;  %vm1107_vm14 = vcmp.gt.s32.totalorder %v1106_v11, 0  ;;  %v1268_v38 = vshll.u32 %v2837_v61, %v1265_v60  ;;  %v1271_v41 = vshll.u32 %v2838_v63, %v1265_v60 }
 0x13f   :  { %v3486_v9 = vshrl.u32 %v420_v14, 30  ;;  %v1274_v48 = vshll.u32 %v2839_v1, %v1265_v60  ;;  %v1277_v31 = vshll.u32 %v2840_v4, %v1265_v60  ;;  %v1280_v46 = vshll.u32 %v2841_v6, %v1265_v60 }
 0x140   :  { %v1269_v24 = vshrl.u32 %v2838_v63, %v1266_v59  ;;  %v1272_v47 = vshrl.u32 %v2839_v1, %v1266_v59  ;;  %v1275_v7 = vshrl.u32 %v2840_v4, %v1266_v59  ;;  %v1278_v19 = vshrl.u32 %v2841_v6, %v1266_v59 }
 0x141   :  { %v422_v18 = vshll.u32 %v3486_v9, 30  ;;  %v1281_v40 = vshrl.u32 %v4030_v16, %v1266_v59  ;;  %v1300_v53 = vand.u32 65535, %v3481_v3  ;;  %vm1283_vm0 = vcmp.lt.s32.totalorder %v3483_v54, 1 }
 0x142   :  { %v1270_v25 = vor.u32 %v1269_v24, %v1268_v38  ;;  %v1273_v35 = vor.u32 %v1272_v47, %v1271_v41  ;;  %v1276_v56 = vor.u32 %v1275_v7, %v1274_v48  ;;  %v1279_v33 = vor.u32 %v1278_v19, %v1277_v31 }
 0x143   :  { %v3500_v21 = vsub.s32 %v419_v58, %v422_v18  ;;  %v1282_v20 = vor.u32 %v1281_v40, %v1280_v46  ;;  %vm1285_vm1 = vcmp.lt.s32.totalorder %v3483_v54, 3  ;;  %vm1286_vm2 = vcmp.lt.s32.totalorder %v3483_v54, 4 }
 0x144   :  { %v1291_v44 = vsel %vm1283_vm0, %v1270_v25, %v1273_v35  ;;  %v1108_v32 = vsel %vm1107_vm14, %v1106_v11, 0  ;;  %v1292_v5 = vsel %vm1286_vm2, %v1279_v33, 920167782  ;;  %v1295_v58 = vsel %vm1283_vm0, %v1273_v35, %v1276_v56 }
 0x145   :  { %vm424_vm3 = vcmp.lt.s32.totalorder %v3500_v21, 0  ;;  %v425_v12 = vsub.s32 0, %v3500_v21  ;;  %v1267_v60 = vshrl.u32 %v2837_v61, %v1266_v59  ;;  %vm1284_vm4 = vcmp.lt.s32.totalorder %v3483_v54, 2 }
 0x146   :  { %v1293_v14 = vsel %vm1285_vm1, %v1276_v56, %v1292_v5  ;;  %v1296_v38 = vsel %vm1286_vm2, %v1282_v20, 1326507024  ;;  %v1288_v48 = vsel %vm1286_vm2, %v1276_v56, 2102212464  ;;  %v1301_v18 = vshrl.u32 %v3481_v3, 16 }
 0x147   :  { %v426_v41 = vsel %vm424_vm3, %v425_v12, %v3500_v21  ;;  %v1294_v11 = vsel %vm1284_vm4, %v1291_v44, %v1293_v14  ;;  %v1297_v24 = vsel %vm1285_vm1, %v1279_v33, %v1296_v38  ;;  %v3524_v40 = vand.u32 31, %v1108_v32 }
 0x148   :  { %v427_v47 = vclz %v426_v41  ;;  %v1298_v7 = vsel %vm1284_vm4, %v1295_v58, %v1297_v24  ;;  %v1324_v59 = vand.u32 65535, %v1294_v11  ;;  %v1325_v31 = vshrl.u32 %v1294_v11, 16 }
 0x149   :  { %v1302_v19 = vand.u32 65535, %v1298_v7  ;;  %v1303_v46 = vshrl.u32 %v1298_v7, 16  ;;  %v1287_v56 = vsel %vm1283_vm0, %v1267_v60, %v1270_v25  ;;  %v1289_v44 = vsel %vm1285_vm1, %v1273_v35, %v1288_v48 }
 0x14a   :  { %v2727_v20 = vadd.s32 4294967294, %v427_v47  ;;  %v1327_v33 = vmul.u32 %v1325_v31, %v1300_v53  ;;  %v3530_v14 = vshll.u32 %v1104_v50, 8  ;;  %v1328_v38 = vmul.u32 %v1324_v59, %v1301_v18 }
 0x14b   :  { %v1305_v12 = vmul.u32 %v1303_v46, %v1300_v53  ;;  %v1306_v5 = vmul.u32 %v1302_v19, %v1301_v18  ;;  %v3533_v11 = vshrl.u32 %v1108_v32, 5  ;;  %v3537_v47 = vsel %vm1284_vm4, %v1287_v56, %v1289_v44 }
 0x14c   :  { %vm2728_vm9 = vcmp.lt.s32.totalorder %v2727_v20, 0  ;;  %v1330_v41 = vshll.u32 %v1327_v33, 16  ;;  %v1304_v25 = vmul.u32 %v1302_v19, %v1300_v53  ;;  %v1307_v48 = vmul.u32 %v1303_v46, %v1301_v18 }
 0x14d   :  { %v430_v24 = vsel %vm2728_vm9, 0, %v2727_v20  ;;  %v1308_v60 = vshll.u32 %v1305_v12, 16  ;;  %v1326_v7 = vmul.u32 %v1324_v59, %v1300_v53  ;;  %v3540_v50 = vsub.s32 32, %v3524_v40 }
 0x14e   :  { %v435_v35 = vsub.s32 4294967266, %v430_v24  ;;  %v1310_v57 = vshll.u32 %v1306_v5, 16  ;;  %v1329_v27 = vmul.u32 %v1325_v31, %v1301_v18  ;;  %v431_v22 = vsub.s32 32, %v430_v24 }
 0x14f   :  { %vm1312_vm10 = vc.u32 %v1304_v25, %v1308_v60  ;;  %v1314_v15 = vadd.s32 %v1308_v60, %v1304_v25  ;;  %v1332_v20 = vshll.u32 %v1328_v38, 16  ;;  %vm1334_vm15 = vc.u32 %v1326_v7, %v1330_v41 }
 0x150   :  { %v1313_v32 = vsel %vm1312_vm10, 1, %v2835_v2  ;;  %v1335_v19 = vsel %vm1334_vm15, 1, %v2835_v2  ;;  %v1336_v56 = vadd.s32 %v1330_v41, %v1326_v7  ;;  %v436_v44 = vadd.s32 127, %v435_v35 }
 0x151   :  { %v1315_v54 = vadd.s32 %v1313_v32, %v1307_v48  ;;  %vm1316_vm8 = vc.u32 %v1314_v15, %v1310_v57  ;;  %v1337_v59 = vadd.s32 %v1335_v19, %v1329_v27  ;;  %v1113_v46 = vshll.u32 %v2837_v61, %v3524_v40 }
 0x152   :  { %v1317_v53 = vsel %vm1316_vm8, 1, %v2835_v2  ;;  %v1309_v58 = vshrl.u32 %v1305_v12, 16  ;;  %v1331_v31 = vshrl.u32 %v1327_v33, 16  ;;  %vm1338_vm11 = vc.u32 %v1336_v56, %v1332_v20 }
 0x153   :  { %v1319_v25 = vadd.s32 %v1317_v53, %v1315_v54  ;;  %v1311_v18 = vshrl.u32 %v1306_v5, 16  ;;  %v1333_v60 = vshrl.u32 %v1328_v38, 16  ;;  %v1339_v16 = vsel %vm1338_vm11, 1, %v2835_v2 }
 0x154   :  { %v1114_v15 = vshrl.u32 %v2838_v63, %v3540_v50  ;;  %v433_v57 = vshrl.u32 %v3479_v39, %v431_v22  ;;  %v1341_v35 = vadd.s32 %v1339_v16, %v1337_v59  ;;  %v1117_v27 = vshrl.u32 %v2839_v1, %v3540_v50 }
 0x155   :  { %v1320_v41 = vadd.s32 %v1319_v25, %v1309_v58  ;;  %v437_v48 = vshll.u32 %v436_v44, 23  ;;  %v1116_v12 = vshll.u32 %v2838_v63, %v3524_v40  ;;  %v1119_v33 = vshll.u32 %v2839_v1, %v3524_v40 }
 0x156   :  { %v1120_v5 = vshrl.u32 %v2840_v4, %v3540_v50  ;;  %v1342_v7 = vadd.s32 %v1341_v35, %v1331_v31  ;;  %v1122_v22 = vshll.u32 %v2840_v4, %v3524_v40  ;;  %v1123_v16 = vshrl.u32 %v2841_v6, %v3540_v50 }
 0x157   :  { %v3559_v38 = vadd.s32 %v1320_v41, %v1311_v18  ;;  %v3565_v39 = vadd.s32 %v1336_v56, %v1332_v20  ;;  %v1115_v58 = vor.u32 %v1114_v15, %v1113_v46  ;;  %v3567_v32 = vor.u32 %v1117_v27, %v1116_v12 }
 0x158   :  { %v4038_v63 = vmov 1326507024   ;;  %v1343_v54 = vadd.s32 %v1342_v7, %v1333_v60  ;;  %v1121_v19 = vor.u32 %v1120_v5, %v1119_v33  ;;  %v1124_v44 = vor.u32 %v1123_v16, %v1122_v22 }
 0x159   :  { %v1126_v1 = vshrl.u32 %v4038_v63, %v3540_v50  ;;  %v1125_v53 = vshll.u32 %v2841_v6, %v3524_v40  ;;  %v432_v59 = vshll.u32 %v3500_v21, %v430_v24  ;;  %v438_v4 = vor.u32 4788187, %v437_v48 }
 0x15a   :  { %v1344_v25 = vmul.u32 %v3481_v3, %v3537_v47  ;;  %vm1346_vm14 = vc.u32 %v3559_v38, %v3565_v39  ;;  %v1347_v20 = vadd.s32 1, %v1343_v54  ;;  %vm1128_vm0 = vcmp.lt.s32.totalorder %v3533_v11, 1 }
 0x15b   :  { %v1127_v56 = vor.u32 %v1126_v1, %v1125_v53  ;;  %vm1131_vm1 = vcmp.lt.s32.totalorder %v3533_v11, 4  ;;  %v434_v46 = vor.u32 %v433_v57, %v432_v59  ;;  %vm1130_vm2 = vcmp.lt.s32.totalorder %v3533_v11, 3 }
 0x15c   :  { %v1136_v6 = vsel %vm1128_vm0, %v1115_v58, %v3567_v32  ;;  %v1137_v21 = vsel %vm1131_vm1, %v1124_v44, 920167782  ;;  %v1348_v3 = vsel %vm1346_vm14, %v1347_v20, %v1343_v54  ;;  %vm1129_vm3 = vcmp.lt.s32.totalorder %v3533_v11, 2 }
 0x15d   :  { %v1138_v40 = vsel %vm1130_vm2, %v1121_v19, %v1137_v21  ;;  %v1145_v24 = vand.u32 65535, %v3530_v14  ;;  %v439_v47 = vand.u32 2147483647, %v438_v4  ;;  %v1349_v31 = vadd.s32 %v1348_v3, %v1344_v25 }
 0x15e   :  { %v1139_v18 = vsel %vm1129_vm3, %v1136_v6, %v1138_v40  ;;  %v1146_v60 = vshrl.u32 %v3530_v14, 16  ;;  %v1140_v15 = vsel %vm1128_vm0, %v3567_v32, %v1121_v19  ;;  %v1141_v57 = vsel %vm1131_vm1, %v1127_v56, 1326507024 }
 0x15f   :  { %v1169_v41 = vand.u32 65535, %v1139_v18  ;;  %v1170_v35 = vshrl.u32 %v1139_v18, 16  ;;  %v441_v27 = vcvt.s32.f32 %v434_v46  ;;  %v1350_v48 = vadd.s32 536870912, %v1349_v31 }
 0x160   :  { %v1142_v12 = vsel %vm1130_vm2, %v1124_v44, %v1141_v57  ;;  %v4039_v33 = vsub.s32 4, %v2962_v17  ;;  %v1112_v7 = vshrl.u32 %v2837_v61, %v3540_v50  ;;  %v915_v21 = vmul.f32 -0.001358992, %v3465_v13 }
 0x161   :  { %v1143_v22 = vsel %vm1129_vm3, %v1140_v15, %v1142_v12  ;;  %v1172_v16 = vmul.u32 %v1170_v35, %v1145_v24  ;;  %v1173_v63 = vmul.u32 %v1169_v41, %v1146_v60  ;;  %v3609_v1 = vmul.f32 %v441_v27, %v439_v47 }
 0x162   :  { %v911_v5 = vsel %vm788_vm5, %v4039_v33, %v2962_v17  ;;  %v3611_v54 = vshrl.u32 %v1350_v48, 30  ;;  %v1147_v53 = vand.u32 65535, %v1143_v22  ;;  %v1148_v44 = vshrl.u32 %v1143_v22, 16 }
 0x163   :  { %v1132_v59 = vsel %vm1128_vm0, %v1112_v7, %v1115_v58  ;;  %v1133_v17 = vsel %vm1131_vm1, %v1121_v19, 2102212464  ;;  %v1171_v4 = vmul.u32 %v1169_v41, %v1145_v24  ;;  %v1175_v25 = vshll.u32 %v1172_v16, 16 }
 0x164   :  { %v1352_v61 = vshll.u32 %v3611_v54, 30  ;;  %v1150_v50 = vmul.u32 %v1148_v44, %v1145_v24  ;;  %v1151_v20 = vmul.u32 %v1147_v53, %v1146_v60  ;;  %v1174_v56 = vmul.u32 %v1170_v35, %v1146_v60 }
 0x165   :  { %v1177_v46 = vshll.u32 %v1173_v63, 16  ;;  %vm1179_vm5 = vc.u32 %v1171_v4, %v1175_v25  ;;  %v1181_v6 = vadd.s32 %v1175_v25, %v1171_v4  ;;  %v1149_v40 = vmul.u32 %v1147_v53, %v1145_v24 }
 0x166   :  { %v3619_v3 = vsub.s32 %v1349_v31, %v1352_v61  ;;  %v1153_v47 = vshll.u32 %v1150_v50, 16  ;;  %v1176_v58 = vshrl.u32 %v1172_v16, 16  ;;  %v1152_v18 = vmul.u32 %v1148_v44, %v1146_v60 }
 0x167   :  { %v1155_v15 = vshll.u32 %v1151_v20, 16  ;;  %v1180_v19 = vsel %vm1179_vm5, 1, %v2835_v2  ;;  %vm1183_vm4 = vc.u32 %v1181_v6, %v1177_v46  ;;  %v916_v48 = vadd.f32 0.041655596, %v915_v21 }
 0x168   :  { %vm1354_vm9 = vcmp.lt.s32.totalorder %v3619_v3, 0  ;;  %v1355_v57 = vsub.s32 0, %v3619_v3  ;;  %vm1157_vm10 = vc.u32 %v1149_v40, %v1153_v47  ;;  %v1159_v41 = vadd.s32 %v1153_v47, %v1149_v40 }
 0x169   :  { %v1158_v35 = vsel %vm1157_vm10, 1, %v2835_v2  ;;  %v1182_v27 = vadd.s32 %v1180_v19, %v1174_v56  ;;  %v1184_v31 = vsel %vm1183_vm4, 1, %v2835_v2  ;;  %v922_v60 = vmul.f32 -0.00019511016, %v3465_v13 }
 0x16a   :  { %v1356_v24 = vsel %vm1354_vm9, %v1355_v57, %v3619_v3  ;;  %v1160_v12 = vadd.s32 %v1158_v35, %v1152_v18  ;;  %vm1161_vm15 = vc.u32 %v1159_v41, %v1155_v15  ;;  %v917_v16 = vmul.f32 %v916_v48, %v3465_v13 }
 0x16b   :  { %v1357_v33 = vclz %v1356_v24  ;;  %v1162_v7 = vsel %vm1161_vm15, 1, %v2835_v2  ;;  %v1186_v22 = vadd.s32 %v1184_v31, %v1182_v27  ;;  %v1134_v53 = vsel %vm1130_vm2, %v3567_v32, %v1133_v17 }
 0x16c   :  { %v1154_v44 = vshrl.u32 %v1150_v50, 16  ;;  %v1164_v4 = vadd.s32 %v1162_v7, %v1160_v12  ;;  %v923_v25 = vadd.f32 0.008332121, %v922_v60  ;;  %v1345_v61 = vadd.s32 %v3565_v39, %v3559_v38 }
 0x16d   :  { %v2745_v56 = vadd.s32 4294967294, %v1357_v33  ;;  %v1178_v21 = vshrl.u32 %v1173_v63, 16  ;;  %v1187_v40 = vadd.s32 %v1186_v22, %v1176_v58  ;;  %v1156_v47 = vshrl.u32 %v1151_v20, 16 }
 0x16e   :  { %v1165_v18 = vadd.s32 %v1164_v4, %v1154_v44  ;;  %v918_v15 = vadd.f32 -0.4999988, %v917_v16  ;;  %v924_v2 = vmul.f32 %v923_v25, %v3465_v13  ;;  %v1135_v19 = vsel %vm1129_vm3, %v1132_v59, %v1134_v53 }
 0x16f   :  { %vm2746_vm8 = vcmp.lt.s32.totalorder %v2745_v56, 0  ;;  %v1188_v57 = vadd.s32 %v1187_v40, %v1178_v21  ;;  %v3640_v32 = vsel %vm3409_vm12, 0, %v911_v5  ;;  %v3644_v38 = vadd.s32 %v1181_v6, %v1177_v46 }
 0x170   :  { %v1360_v17 = vsel %vm2746_vm8, 0, %v2745_v56  ;;  %v3642_v50 = vadd.s32 %v1165_v18, %v1156_v47  ;;  %v925_v39 = vadd.f32 -0.16666654, %v924_v2  ;;  %v4040_v63 = vand.u32 2147483647, %v2965_v26 }
 0x171   :  { %vm633_vm14 = vcmp.lt.s32.totalorder %v3175_v23, 0  ;;  %v1361_v11 = vsub.s32 32, %v1360_v17  ;;  %v1365_v59 = vsub.s32 4294967266, %v1360_v17  ;;  %v1192_v58 = vadd.s32 1, %v1188_v57 }
 0x172   :  { %vm3648_vm11 = vcmp.le.f32.partialorder %v4040_v63, 0.7853982  ;;  %v1065_v10 = vsub.s32 4, %v3007_v36  ;;  %vm323_vm12 = vcmp.lt.s32.totalorder %v3205_v45, 0  ;;  %v1189_v5 = vmul.u32 %v3530_v14, %v1135_v19 }
 0x173   :  { %vm1191_vm0 = vc.u32 %v3642_v50, %v3644_v38  ;;  %v919_v46 = vmul.f32 %v918_v15, %v3465_v13  ;;  %v926_v6 = vmul.f32 %v925_v39, %v3465_v13  ;;  %v1362_v41 = vshll.u32 %v3619_v3, %v1360_v17 }
 0x174   :  { %v1363_v35 = vshrl.u32 %v1345_v61, %v1361_v11  ;;  %v1366_v27 = vadd.s32 127, %v1365_v59  ;;  %v1193_v31 = vsel %vm1191_vm0, %v1192_v58, %v1188_v57  ;;  %v4043_v48 = vand.u32 2147483647, %v3175_v23 }
 0x175   :  { %v1194_v12 = vadd.s32 %v1193_v31, %v1189_v5  ;;  %v927_v14 = vadd.f32 1.0, %v926_v6  ;;  %v930_v60 = vadd.s32 3, %v3640_v32  ;;  %v1070_v33 = vmul.f32 -0.001358992, %v3469_v0 }
 0x176   :  { %vm3663_vm1 = vcmp.le.f32.partialorder %v4043_v48, 0.7853982  ;;  %v1364_v7 = vor.u32 %v1363_v35, %v1362_v41  ;;  %v1367_v22 = vshll.u32 %v1366_v27, 23  ;;  %v1066_v13 = vsel %vm943_vm6, %v1065_v10, %v3007_v36  ;;  %v3720_v35 = vpop.permute.xlu2 %2802 }
 0x177   :  { %v1077_v3 = vmul.f32 -0.00019511016, %v3469_v0  ;;  %v753_v16 = vxor.u32 2147483648, %v3477_v8  ;;  %v1195_v53 = vadd.s32 536870912, %v1194_v12  ;;  %v3675_v44 = vmul.f32 %v927_v14, %v3449_v34 }
 0x178   :  { %v1071_v4 = vadd.f32 0.041655596, %v1070_v33  ;;  %v443_v25 = vxor.u32 2147483648, %v3609_v1  ;;  %v1368_v61 = vor.u32 4788187, %v1367_v22  ;;  %v3678_v56 = vadd.f32 1.0, %v919_v46 }
 0x179   :  { %v1078_v21 = vadd.f32 0.008332121, %v1077_v3  ;;  %v3680_v40 = vshrl.u32 %v1195_v53, 30  ;;  %v931_v47 = vand.u32 3, %v930_v60  ;;  %v1068_v36 = vsel %vm3420_vm13, 0, %v1066_v13 }
 0x17a   :  { %v1072_v18 = vmul.f32 %v1071_v4, %v3469_v0  ;;  %v1369_v15 = vand.u32 2147483647, %v1368_v61  ;;  %v1371_v2 = vcvt.s32.f32 %v1364_v7  ;;  %v934_v34 = vxor.u32 2147483648, %v3675_v44 }
 0x17b   :  { %v1079_v19 = vmul.f32 %v1078_v21, %v3469_v0  ;;  %v3691_v57 = vsel %vm3648_vm11, %v2965_v26, %v3474_v62  ;;  %v754_v17 = vsel %vm633_vm14, %v753_v16, %v3477_v8  ;;  %v4046_v29 = vand.u32 2147483647, %v3205_v45 }
 0x17c   :  { %v1197_v63 = vshll.u32 %v3680_v40, 30  ;;  %v444_v11 = vsel %vm323_vm12, %v443_v25, %v3609_v1  ;;  %v1372_v59 = vmul.f32 %v1371_v2, %v1369_v15  ;;  %v937_v62 = vxor.u32 2147483648, %v3678_v56 }
 0x17d   :  { %vm3698_vm6 = vcmp.le.f32.partialorder %v4046_v29, 0.7853982  ;;  %v1080_v58 = vadd.f32 -0.16666654, %v1079_v19  ;;  %vm933_vm13 = vcmp.eq.s32.totalorder %v931_v47, 0  ;;  %v1085_v5 = vadd.s32 3, %v1068_v36 }
 0x17e   :  { %v3707_v10 = vsub.s32 %v1194_v12, %v1197_v63  ;;  %v1073_v8 = vadd.f32 -0.4999988, %v1072_v18  ;;  %v3711_v46 = vmul.f32 %v3691_v57, %v3691_v57  ;;  %v3716_v6 = vsel %vm3663_vm1, %v3175_v23, %v754_v17 }
 0x17f   :  { %v935_v1 = vsel %vm933_vm13, %v3678_v56, %v934_v34  ;;  %v1081_v41 = vmul.f32 %v1080_v58, %v3469_v0  ;;  %v1373_v27 = vxor.u32 2147483648, %v1372_v59  ;;  %vm936_vm3 = vcmp.eq.s32.totalorder %v931_v47, 2 }
 0x180   :  { %vm1199_vm2 = vcmp.lt.s32.totalorder %v3707_v10, 0  ;;  %v1200_v31 = vsub.s32 0, %v3707_v10  ;;  %v3727_v48 = vsel %vm3698_vm6, %v3205_v45, %v444_v11  ;;  %vm932_vm5 = vcmp.lt.s32.totalorder %v931_v47, 2 }
 0x181   :  { %v938_v12 = vsel %vm936_vm3, %v937_v62, %v3675_v44  ;;  %v3731_v14 = vand.u32 3, %v3640_v32  ;;  %v1074_v7 = vmul.f32 %v1073_v8, %v3469_v0  ;;  %v3735_v22 = vand.u32 3, %v1085_v5 }
 0x182   :  { %v1201_v60 = vsel %vm1199_vm2, %v1200_v31, %v3707_v10  ;;  %v939_v33 = vsel %vm932_vm5, %v935_v1, %v938_v12  ;;  %v2804_v13 = vunpack.i.l.bf16 %v3720_v35  ;;  %vm1253_vm4 = vcmp.lt.s32.totalorder %v3402_v37, 0 }
 0x183   :  { %v1202_v3 = vclz %v1201_v60  ;;  %v1082_v16 = vadd.f32 1.0, %v1081_v41  ;;  %v3741_v53 = vmul.f32 %v3716_v6, %v3716_v6  ;;  %v4049_v32 = vand.u32 2147483647, %v3402_v37 }
 0x184   :  { %v1374_v0 = vsel %vm1253_vm4, %v1373_v27, %v1372_v59  ;;  %vm4031_vm10 = vweird.f32 %v2875_v43  ;;  %v3754_v25 = vmul.f32 %v3727_v48, %v3727_v48  ;;  %v1190_v61 = vadd.s32 %v3644_v38, %v3642_v50  ;;  %v3786_v27 = vpop.permute.xlu1 %2797 }
 0x185   :  { %vm3745_vm9 = vcmp.le.f32.partialorder %v4049_v32, 0.7853982  ;;  %v2742_v21 = vadd.s32 4294967294, %v1202_v3  ;;  %v3760_v47 = vsel %vm4031_vm10, nan, %v939_v33  ;;  %v1075_v18 = vadd.f32 1.0, %v1074_v7 }
 0x186   :  { %vm1091_vm15 = vcmp.eq.s32.totalorder %v3735_v22, 2  ;;  %vm2185_vm8 = vcmp.eq.s32.totalorder %v3731_v14, 0  ;;  %v2337_v15 = vand.u32 3, %v1068_v36  ;;  %v3767_v2 = vsel %vm3745_vm9, %v3402_v37, %v1374_v0 }
 0x187   :  { %vm2743_vm0 = vcmp.lt.s32.totalorder %v2742_v21, 0  ;;  %v1083_v19 = vmul.f32 %v1082_v16, %v3456_v55  ;;  %vm2188_vm13 = vcmp.eq.s32.totalorder %v3731_v14, 2  ;;  %v600_v38 = vsub.s32 4, %v3157_v49 }
 0x188   :  { %v1205_v50 = vsel %vm2743_vm0, 0, %v2742_v21  ;;  %v605_v17 = vmul.f32 -0.001358992, %v3711_v46  ;;  %v612_v29 = vmul.f32 -0.00019511016, %v3711_v46  ;;  %vm1088_vm2 = vcmp.eq.s32.totalorder %v3735_v22, 0 }
 0x189   :  { %v1206_v63 = vsub.s32 32, %v1205_v50  ;;  %v1210_v11 = vsub.s32 4294967266, %v1205_v50  ;;  %v3776_v36 = vsel %vm2185_vm8, %v3678_v56, %v934_v34  ;;  %v3779_v59 = vsel %vm2188_vm13, %v937_v62, %v3675_v44 }
 0x18a   :  { %v3783_v55 = vmul.f32 %v3767_v2, %v3767_v2  ;;  %v1092_v58 = vxor.u32 2147483648, %v1075_v18  ;;  %vm2339_vm3 = vcmp.eq.s32.totalorder %v2337_v15, 0  ;;  %vm2342_vm5 = vcmp.eq.s32.totalorder %v2337_v15, 2 }
 0x18b   :  { %v1207_v8 = vshll.u32 %v3707_v10, %v1205_v50  ;;  %v1208_v5 = vshrl.u32 %v1190_v61, %v1206_v63  ;;  %v1211_v1 = vadd.s32 127, %v1210_v11  ;;  %v1089_v41 = vxor.u32 2147483648, %v1083_v19 }
 0x18c   :  { %vm2338_vm0 = vcmp.lt.s32.totalorder %v2337_v15, 2  ;;  %v601_v44 = vsel %vm478_vm7, %v600_v38, %v3157_v49  ;;  %v606_v56 = vadd.f32 0.041655596, %v605_v17  ;;  %v613_v34 = vadd.f32 0.008332121, %v612_v29 }
 0x18d   :  { %v755_v62 = vsub.s32 4, %v3335_v51  ;;  %v1209_v31 = vor.u32 %v1208_v5, %v1207_v8  ;;  %v1212_v12 = vshll.u32 %v1211_v1, 23  ;;  %vm1087_vm8 = vcmp.lt.s32.totalorder %v3735_v22, 2 }
 0x18e   :  { %v760_v10 = vmul.f32 -0.001358992, %v3741_v53  ;;  %v767_v60 = vmul.f32 -0.00019511016, %v3741_v53  ;;  %vm1098_vm13 = vcmp.lt.s32.totalorder %v3416_v28, 0  ;;  %v1093_v33 = vsel %vm1091_vm15, %v1092_v58, %v1083_v19 }
 0x18f   :  { %v2800_v7 = vunpack.i.h.bf16 %v3786_v27  ;;  %v607_v49 = vmul.f32 %v606_v56, %v3711_v46  ;;  %v614_v3 = vmul.f32 %v613_v34, %v3711_v46  ;;  %v1213_v16 = vor.u32 4788187, %v1212_v12 }
 0x190   :  { %vm1084_vm7 = vweird.f32 %v2882_v52  ;;  %v2341_v32 = vsel %vm2339_vm3, %v1075_v18, %v1089_v41  ;;  %v2344_v0 = vsel %vm2342_vm5, %v1092_v58, %v1083_v19  ;;  %v761_v61 = vadd.f32 0.041655596, %v760_v10 }
 0x191   :  { %v603_v21 = vsel %vm3648_vm11, 0, %v601_v44  ;;  %v608_v50 = vadd.f32 -0.4999988, %v607_v49  ;;  %v615_v38 = vadd.f32 -0.16666654, %v614_v3  ;;  %v756_v17 = vsel %vm633_vm14, %v755_v62, %v3335_v51 }
 0x192   :  { %v4052_v29 = vand.u32 2147483647, %v3416_v28  ;;  %v1214_v11 = vand.u32 2147483647, %v1213_v16  ;;  %v1216_v8 = vcvt.s32.f32 %v1209_v31  ;;  %v762_v19 = vmul.f32 %v761_v61, %v3741_v53 }
 0x193   :  { %v768_v58 = vadd.f32 0.008332121, %v767_v60  ;;  %v1090_v20 = vsel %vm1088_vm2, %v1075_v18, %v1089_v41  ;;  %v2799_v5 = vunpack.i.l.bf16 %v3786_v27  ;;  %v609_v1 = vmul.f32 %v608_v50, %v3711_v46 }
 0x194   :  { %vm3811_vm15 = vcmp.le.f32.partialorder %v4052_v29, 0.7853982  ;;  %v616_v51 = vmul.f32 %v615_v38, %v3711_v46  ;;  %v1217_v44 = vmul.f32 %v1216_v8, %v1214_v11  ;;  %v620_v56 = vadd.s32 3, %v603_v21  ;;  %v3847_v11 = vpop.permute.xlu0 %2792 }
 0x195   :  { %v763_v34 = vadd.f32 -0.4999988, %v762_v19  ;;  %v769_v62 = vmul.f32 %v768_v58, %v3741_v53  ;;  %v2345_v12 = vsel %vm2338_vm0, %v2341_v32, %v2344_v0  ;;  %v610_v31 = vadd.f32 1.0, %v609_v1 }
 0x196   :  { %v617_v10 = vadd.f32 1.0, %v616_v51  ;;  %v758_v60 = vsel %vm3663_vm1, 0, %v756_v17  ;;  %v1218_v49 = vxor.u32 2147483648, %v1217_v44  ;;  %v1875_v3 = vand.u32 3, %v603_v21 }
 0x197   :  { %v764_v18 = vmul.f32 %v763_v34, %v3741_v53  ;;  %v770_v41 = vadd.f32 -0.16666654, %v769_v62  ;;  %v3828_v46 = vsel %vm1087_vm8, %v1090_v20, %v1093_v33  ;;  %vm619_vm11 = vweird.f32 %v2965_v26 }
 0x198   :  { %v618_v16 = vmul.f32 %v617_v10, %v3691_v57  ;;  %v627_v15 = vxor.u32 2147483648, %v610_v31  ;;  %v1219_v32 = vsel %vm1098_vm13, %v1218_v49, %v1217_v44  ;;  %v621_v0 = vand.u32 3, %v620_v56 }
 0x199   :  { %v765_v24 = vadd.f32 1.0, %v764_v18  ;;  %v771_v61 = vmul.f32 %v770_v41, %v3741_v53  ;;  %v2346_v50 = vsel %vm1084_vm7, nan, %v2345_v12  ;;  %v3840_v22 = vmul.f32 %v2799_v5, %v3760_v47 }
 0x19a   :  { %v624_v33 = vxor.u32 2147483648, %v618_v16  ;;  %v775_v57 = vadd.s32 3, %v758_v60  ;;  %vm1877_vm14 = vcmp.eq.s32.totalorder %v1875_v3, 0  ;;  %vm1880_vm1 = vcmp.eq.s32.totalorder %v1875_v3, 2 }
 0x19b   :  { %v772_v21 = vadd.f32 1.0, %v771_v61  ;;  %v2029_v38 = vand.u32 3, %v758_v60  ;;  %v3845_v17 = vsel %vm3811_vm15, %v3416_v28, %v1219_v32  ;;  %vm1876_vm2 = vcmp.lt.s32.totalorder %v1875_v3, 2 }
 0x19c   :  { %v1879_v53 = vsel %vm1877_vm14, %v610_v31, %v624_v33  ;;  %v1882_v29 = vsel %vm1880_vm1, %v627_v15, %v618_v16  ;;  %vm622_vm3 = vcmp.lt.s32.totalorder %v621_v0, 2  ;;  %v782_v8 = vxor.u32 2147483648, %v765_v24 }
 0x19d   :  { %v773_v47 = vmul.f32 %v772_v21, %v3716_v6  ;;  %v1883_v19 = vsel %vm1876_vm2, %v1879_v53, %v1882_v29  ;;  %vm623_vm5 = vcmp.eq.s32.totalorder %v621_v0, 0  ;;  %vm774_vm0 = vweird.f32 %v3175_v23 }
 0x19e   :  { %v776_v58 = vand.u32 3, %v775_v57  ;;  %v1884_v20 = vsel %vm619_vm11, nan, %v1883_v19  ;;  %v3855_v1 = vmul.f32 %v3845_v17, %v3845_v17  ;;  %vm2030_vm8 = vcmp.lt.s32.totalorder %v2029_v38, 2 }
 0x19f   :  { %v779_v51 = vxor.u32 2147483648, %v773_v47  ;;  %v2794_v44 = vunpack.i.l.bf16 %v3847_v11  ;;  %vm2031_vm14 = vcmp.eq.s32.totalorder %v2029_v38, 0  ;;  %vm2034_vm1 = vcmp.eq.s32.totalorder %v2029_v38, 2 }
 0x1a0   :  { %v450_v6 = vmul.f32 -0.001358992, %v3754_v25  ;;  %v457_v56 = vmul.f32 -0.00019511016, %v3754_v25  ;;  %v2036_v62 = vsel %vm2034_vm1, %v782_v8, %v773_v47  ;;  %v445_v10 = vsub.s32 4, %v3486_v9 }
 0x1a1   :  { %v2033_v34 = vsel %vm2031_vm14, %v765_v24, %v779_v51  ;;  %v2657_v12 = vmul.f32 %v2794_v44, %v1884_v20  ;;  %v625_v60 = vsel %vm623_vm5, %v610_v31, %v624_v33  ;;  %v2795_v18 = vunpack.i.h.bf16 %v3847_v11 }
 0x1a2   :  { %v2037_v49 = vsel %vm2030_vm8, %v2033_v34, %v2036_v62  ;;  %v451_v41 = vadd.f32 0.041655596, %v450_v6  ;;  %vm626_vm2 = vcmp.eq.s32.totalorder %v621_v0, 2  ;;  %vm778_vm10 = vcmp.eq.s32.totalorder %v776_v58, 0 }
 0x1a3   :  { %v2038_v3 = vsel %vm774_vm0, nan, %v2037_v49  ;;  %2675 = vrot.lane.b32.xlu2 %v2657_v12, %s2843_s14  ;;  %v458_v32 = vadd.f32 0.008332121, %v457_v56  ;;  %v628_v61 = vsel %vm626_vm2, %v627_v15, %v618_v16  ;;  %vm781_vm14 = vcmp.eq.s32.totalorder %v776_v58, 2 }
 0x1a4   :  { %v2658_v57 = vmul.f32 %v2795_v18, %v2038_v3  ;;  %v452_v21 = vmul.f32 %v451_v41, %v3754_v25  ;;  %v629_v31 = vsel %vm622_vm3, %v625_v60, %v628_v61  ;;  %v446_v33 = vsel %vm323_vm12, %v445_v10, %v3486_v9 }
 0x1a5   :  { %v459_v38 = vmul.f32 %v458_v32, %v3754_v25  ;;  %v1225_v53 = vmul.f32 -0.001358992, %v3855_v1  ;;  %v780_v29 = vsel %vm778_vm10, %v765_v24, %v779_v51  ;;  %v1220_v16 = vsub.s32 4, %v3680_v40 }
 0x1a6   :  { %v453_v19 = vadd.f32 -0.4999988, %v452_v21  ;;  %2677 = vrot.lane.b32.xlu0 %v2658_v57, %s2843_s14  ;;  %v1232_v15 = vmul.f32 -0.00019511016, %v3855_v1  ;;  %v2660_v0 = vmul.f32 %v2800_v7, %v2346_v50  ;;  %vm777_vm3 = vcmp.lt.s32.totalorder %v776_v58, 2 }
 0x1a7   :  { %v783_v20 = vsel %vm781_vm14, %v782_v8, %v773_v47  ;;  %v460_v6 = vadd.f32 -0.16666654, %v459_v38  ;;  %v3882_v9 = vsel %vm3698_vm6, 0, %v446_v33  ;;  %v1226_v24 = vadd.f32 0.041655596, %v1225_v53 }
 0x1a8   :  { %v454_v56 = vmul.f32 %v453_v19, %v3754_v25  ;;  %v1233_v51 = vadd.f32 0.008332121, %v1232_v15  ;;  %v630_v34 = vsel %vm619_vm11, nan, %v629_v31  ;;  %v784_v62 = vsel %vm777_vm3, %v780_v29, %v783_v20 }
 0x1a9   :  { %v461_v12 = vmul.f32 %v460_v6, %v3754_v25  ;;  %v1380_v10 = vmul.f32 -0.001358992, %v3783_v55  ;;  %v1221_v39 = vsel %vm1098_vm13, %v1220_v16, %v3680_v40  ;;  %v1227_v47 = vmul.f32 %v1226_v24, %v3855_v1 }
 0x1aa   :  { %v3889_v50 = vadd.f32 1.0, %v454_v56  ;;  %v1234_v8 = vmul.f32 %v1233_v51, %v3855_v1  ;;  %v1095_v26 = vsel %vm1084_vm7, nan, %v3828_v46  ;;  %v1721_v60 = vand.u32 3, %v3882_v9 }
 0x1ab   :  { %v462_v58 = vadd.f32 1.0, %v461_v12  ;;  %2681 = vrot.lane.b32.xlu2 %v2660_v0, %s2843_s14  ;;  %v1381_v25 = vadd.f32 0.041655596, %v1380_v10  ;;  %vm2184_vm12 = vcmp.lt.s32.totalorder %v3731_v14, 2  ;;  %v1408_v49 = vmul.f32 %v2794_v44, %v630_v34 }
 0x1ac   :  { %vm464_vm6 = vweird.f32 %v3205_v45  ;;  %v1228_v40 = vadd.f32 -0.4999988, %v1227_v47  ;;  %v1235_v41 = vadd.f32 -0.16666654, %v1234_v8  ;;  %v785_v3 = vsel %vm774_vm0, nan, %v784_v62 }
 0x1ad   :  { %v3906_v32 = vmul.f32 %v462_v58, %v3727_v48  ;;  %v472_v52 = vxor.u32 2147483648, %v3889_v50  ;;  %v3911_v46 = vsel %vm3811_vm15, 0, %v1221_v39  ;;  %v1382_v57 = vmul.f32 %v1381_v25, %v3783_v55 }
 0x1ae   :  { %v1229_v61 = vmul.f32 %v1228_v40, %v3855_v1  ;;  %v1236_v44 = vmul.f32 %v1235_v41, %v3855_v1  ;;  %v1387_v21 = vmul.f32 -0.00019511016, %v3783_v55  ;;  %vm1723_vm10 = vcmp.eq.s32.totalorder %v1721_v60, 0 }
 0x1af   :  { %v469_v23 = vxor.u32 2147483648, %v3906_v32  ;;  %vm1726_vm13 = vcmp.eq.s32.totalorder %v1721_v60, 2  ;;  %v1375_v48 = vsub.s32 4, %v3611_v54  ;;  %v1383_v63 = vadd.f32 -0.4999988, %v1382_v57 }
 0x1b0   :  { %v3919_v31 = vadd.f32 1.0, %v1229_v61  ;;  %v1237_v33 = vadd.f32 1.0, %v1236_v44  ;;  %v1388_v38 = vadd.f32 0.008332121, %v1387_v21  ;;  %vm1722_vm7 = vcmp.lt.s32.totalorder %v1721_v60, 2 }
 0x1b1   :  { %v1725_v1 = vsel %vm1723_vm10, %v3889_v50, %v469_v23  ;;  %v1728_v53 = vsel %vm1726_vm13, %v472_v52, %v3906_v32  ;;  %v2491_v29 = vand.u32 3, %v3911_v46  ;;  %v1409_v19 = vmul.f32 %v2795_v18, %v785_v3 }
 0x1b2   :  { %v1729_v16 = vsel %vm1722_vm7, %v1725_v1, %v1728_v53  ;;  %v3931_v15 = vmul.f32 %v1237_v33, %v3845_v17  ;;  %v1247_v0 = vxor.u32 2147483648, %v3919_v31  ;;  %v1384_v6 = vmul.f32 %v1383_v63, %v3783_v55  ;;  %v2672_v33 = vpop.permute.xlu0 %2671 }
 0x1b3   :  { %v1730_v20 = vsel %vm464_vm6, nan, %v1729_v16  ;;  %v1389_v56 = vmul.f32 %v1388_v38, %v3783_v55  ;;  %vm1414_vm15 = vcmask 125952   ;;  %v1411_v24 = vmul.f32 %v2800_v7, %v1095_v26 }
 0x1b4   :  { %v4055_v11 = vunpack.i.h.bf16 %v3209_v42  ;;  %v1244_v51 = vxor.u32 2147483648, %v3931_v15  ;;  %v1376_v17 = vsel %vm1253_vm4, %v1375_v48, %v3611_v54  ;;  %1417 = vst.msk [vmem:[#allocation3 + $0x8] sm:$0xf] %vm1414_vm15, %v1408_v49  ;;  %v2191_v34 = vsel %vm2184_vm12, %v3776_v36, %v3779_v59 }
 0x1b5   :  { %vm2493_vm11 = vcmp.eq.s32.totalorder %v2491_v29, 0  ;;  %vm2496_vm5 = vcmp.eq.s32.totalorder %v2491_v29, 2  ;;  %v1390_v62 = vadd.f32 -0.16666654, %v1389_v56  ;;  %1415 = vst.msk [vmem:[#allocation3] sm:$0xf] %vm1414_vm15, %v3392_v30  ;;  %vm1239_vm0 = vweird.f32 %v3416_v28 }
 0x1b6   :  { %v2656_v18 = vmul.f32 %v4055_v11, %v1730_v20  ;;  %vm2492_vm8 = vcmp.lt.s32.totalorder %v2491_v29, 2  ;;  %v2495_v54 = vsel %vm2493_vm11, %v3919_v31, %v1244_v51  ;;  %v2498_v14 = vsel %vm2496_vm5, %v1247_v0, %v3931_v15  ;;  %1418 = vst.msk [vmem:[#allocation3 + $0xc] sm:$0xf] %vm1414_vm15, %v1409_v19 }
 0x1b7   :  { %v2499_v36 = vsel %vm2492_vm8, %v2495_v54, %v2498_v14  ;;  %v1378_v59 = vsel %vm3745_vm9, 0, %v1376_v17  ;;  %v1385_v30 = vadd.f32 1.0, %v1384_v6  ;;  %v1391_v7 = vmul.f32 %v1390_v62, %v3783_v55  ;;  %1419 = vst.msk [vmem:[#allocation3 + $0x10] sm:$0xf] %vm1414_vm15, %v3840_v22 }
 0x1b8   :  { %2673 = vrot.lane.b32.xlu1 %v2656_v18, %s2843_s14  ;;  %v2500_v12 = vsel %vm1239_vm0, nan, %v2499_v36  ;;  %1420 = vst.msk [vmem:[#allocation3 + $0x14] sm:$0xf] %vm1414_vm15, %v1411_v24  ;;  %vm4056_vm4 = vweird.f32 %v2875_v43  ;;  %v2645_v4 = vand.u32 3, %v1378_v59  ;;  %vm1394_vm14 = vweird.f32 %v3402_v37 }
 0x1b9   :  { %v2192_v10 = vsel %vm4056_vm4, nan, %v2191_v34  ;;  %v2661_v39 = vmul.f32 %v2804_v13, %v2500_v12  ;;  %v1392_v47 = vadd.f32 1.0, %v1391_v7  ;;  %v1402_v8 = vxor.u32 2147483648, %v1385_v30 }
 0x1ba   :  { %v2659_v22 = vmul.f32 %v2799_v5, %v2192_v10  ;;  %vm2647_vm9 = vcmp.eq.s32.totalorder %v2645_v4, 0  ;;  %vm2650_vm1 = vcmp.eq.s32.totalorder %v2645_v4, 2  ;;  %vm2646_vm2 = vcmp.lt.s32.totalorder %v2645_v4, 2 }
 0x1bb   :  { %2683 = vrot.lane.b32.xlu0 %v2661_v39, %s2843_s14  ;;  %v1393_v55 = vmul.f32 %v1392_v47, %v3767_v2  ;;  %v2805_v2 = vunpack.i.h.bf16 %v3720_v35  ;;  %v465_v27 = vadd.s32 3, %v3882_v9  ;;  %v1240_v40 = vadd.s32 3, %v3911_v46 }
 0x1bc   :  { %v1395_v41 = vadd.s32 3, %v1378_v59  ;;  %v4057_v21 = vmov %v4055_v11  ;;  %vm2695_vm13 = vcmask 257152  }
 0x1bd   :  { %v1399_v26 = vxor.u32 2147483648, %v1393_v55  ;;  %v2652_v58 = vsel %vm2650_vm1, %v1402_v8, %v1393_v55  ;;  %v466_v5 = vand.u32 3, %v465_v27  ;;  %v1241_v9 = vand.u32 3, %v1240_v40  ;;  %2696 = vst.msk [vmem:[#allocation3] sm:$0xf] %vm2695_vm13, %v2672_v33 }
 0x1be   :  { %v1396_v48 = vand.u32 3, %v1395_v41 }
 0x1bf   :  { %v2649_v43 = vsel %vm2647_vm9, %v1385_v30, %v1399_v26  ;;  %vm468_vm3 = vcmp.eq.s32.totalorder %v466_v5, 0  ;;  %vm471_vm12 = vcmp.eq.s32.totalorder %v466_v5, 2  ;;  %vm467_vm10 = vcmp.lt.s32.totalorder %v466_v5, 2 }
 0x1c0   :  { %2679 = vrot.lane.b32.xlu1 %v2659_v22, %s2843_s14  ;;  %v2653_v60 = vsel %vm2646_vm2, %v2649_v43, %v2652_v58  ;;  %v470_v3 = vsel %vm468_vm3, %v3889_v50, %v469_v23  ;;  %v473_v61 = vsel %vm471_vm12, %v472_v52, %v3906_v32  ;;  %vm1242_vm7 = vcmp.lt.s32.totalorder %v1241_v9, 2 }
 0x1c1   :  { %v2654_v25 = vsel %vm1394_vm14, nan, %v2653_v60  ;;  %v474_v44 = vsel %vm467_vm10, %v470_v3, %v473_v61  ;;  %vm1243_vm11 = vcmp.eq.s32.totalorder %v1241_v9, 0  ;;  %vm1246_vm5 = vcmp.eq.s32.totalorder %v1241_v9, 2 }
 0x1c2   :  { %v2662_v49 = vmul.f32 %v2805_v2, %v2654_v25  ;;  %v475_v57 = vsel %vm464_vm6, nan, %v474_v44  ;;  %vm1397_vm8 = vcmp.lt.s32.totalorder %v1396_v48, 2  ;;  %vm1398_vm4 = vcmp.eq.s32.totalorder %v1396_v48, 0 }
 0x1c3   :  { %v1407_v46 = vmul.f32 %v4057_v21, %v475_v57  ;;  %vm1401_vm9 = vcmp.eq.s32.totalorder %v1396_v48, 2  ;;  %v1245_v45 = vsel %vm1243_vm11, %v3919_v31, %v1244_v51  ;;  %v1248_v42 = vsel %vm1246_vm5, %v1247_v0, %v3931_v15 }
 0x1c4   :  { %v1400_v50 = vsel %vm1398_vm4, %v1385_v30, %v1399_v26  ;;  %v1403_v32 = vsel %vm1401_vm9, %v1402_v8, %v1393_v55  ;;  %v1249_v52 = vsel %vm1242_vm7, %v1245_v45, %v1248_v42 }
 0x1c5   :  { %1416 = vst.msk [vmem:[#allocation3 + $0x4] sm:$0xf] %vm1414_vm15, %v1407_v46  ;;  %v1404_v23 = vsel %vm1397_vm8, %v1400_v50, %v1403_v32  ;;  %v1250_v63 = vsel %vm1239_vm0, nan, %v1249_v52 }
 0x1c6   :  { %v1405_v38 = vsel %vm1394_vm14, nan, %v1404_v23  ;;  %v1412_v1 = vmul.f32 %v2804_v13, %v1250_v63 }
 0x1c7   :  { %v1413_v53 = vmul.f32 %v2805_v2, %v1405_v38 }
 0x1c8   :  { %2685 = vrot.lane.b32.xlu1 %v2662_v49, %s2843_s14  ;;  %1421 = vst.msk [vmem:[#allocation3 + $0x18] sm:$0xf] %vm1414_vm15, %v1412_v1 }
 0x1c9   :  { %1422 = vst.msk [vmem:[#allocation3 + $0x1c] sm:$0xf] %vm1414_vm15, %v1413_v53 }
 0x1fd   :  { %v2676_v31 = vpop.permute.xlu2 %2675 }
 0x1fe   :  { %2698 = vst.msk [vmem:[#allocation3 + $0x8] sm:$0xf] %vm2695_vm13, %v2676_v31 }
 0x205   :  { %v2682_v29 = vpop.permute.xlu2 %2681 }
 0x206   :  { %2701 = vst.msk [vmem:[#allocation3 + $0x14] sm:$0xf] %vm2695_vm13, %v2682_v29 }
 0x218   :  { %v2678_v19 = vpop.permute.xlu0 %2677 }
 0x219   :  { %2699 = vst.msk [vmem:[#allocation3 + $0xc] sm:$0xf] %vm2695_vm13, %v2678_v19 }
 0x22a   :  { %v2674_v28 = vpop.permute.xlu1 %2673 }
 0x22b   :  { %2697 = vst.msk [vmem:[#allocation3 + $0x4] sm:$0xf] %vm2695_vm13, %v2674_v28 }
 0x22d   :  { %v2684_v37 = vpop.permute.xlu0 %2683 }
 0x22e   :  { %2702 = vst.msk [vmem:[#allocation3 + $0x18] sm:$0xf] %vm2695_vm13, %v2684_v37 }
 0x232   :  { %v2680_v35 = vpop.permute.xlu1 %2679 }
 0x233   :  { %2700 = vst.msk [vmem:[#allocation3 + $0x10] sm:$0xf] %vm2695_vm13, %v2680_v35 }
 0x23a   :  { %v2686_v13 = vpop.permute.xlu1 %2685 }
 0x23b   :  { %2703 = vst.msk [vmem:[#allocation3 + $0x1c] sm:$0xf] %vm2695_vm13, %v2686_v13 }
 0x23c   :  { %2716 = dma.vmem_to_hbm [thread:$0]  %s2709_s15, 512, %s2711_s18, [#allocation4], %s2845_s19, %s2845_s19, %s2846_s20  }
 0x23d   :  { %2833 = dma.done.wait [#allocation4], 512  }
 0x23e   :  { %2834 = vsyncadd [#allocation4], 4294966784 }
 0x23f   :  { %2721 = vsyncpa [#allocation4], 1 }

</bundles_post_ra>
